<compile_context>
chip_gen: v6e
topology: v6e:2x2x1
jax: 0.10.0
libtpu: 0.0.40
codegen_flags: <defaults>
</compile_context>

<pallas_src>
import functools

import jax
import jax.numpy as jnp
from jax.experimental import pallas as pl
from jax.experimental.pallas import tpu as pltpu


def _round_up(x, m):
    return (x + m - 1) // m * m


@functools.lru_cache(maxsize=None)
def _vmem_limit_bytes():
    """Generation-aware VMEM limit with headroom (v7x has only 64 MiB physical)."""
    phys = 128 * 1024 * 1024
    try:
        phys = int(pltpu.get_tpu_info().vmem_capacity_bytes)
    except Exception:
        pass
    return int(max(32 * 1024 * 1024,
                   min(phys - 16 * 1024 * 1024, 100 * 1024 * 1024)))


# ------------------------- tiled GEMM (+bias, optional ReLU) -------------------------

def _matmul_kernel(x_ref, w_ref, b_ref, o_ref, acc_ref, *, apply_relu):
    @pl.when(pl.program_id(2) == 0)
    def _():
        acc_ref[...] = jnp.zeros_like(acc_ref)

    acc_ref[...] += jnp.dot(x_ref[...], w_ref[...],
                            preferred_element_type=jnp.float32)

    @pl.when(pl.program_id(2) == pl.num_programs(2) - 1)
    def _():
        y = acc_ref[...] + b_ref[...]
        if apply_relu:
            y = jnp.maximum(y, 0.0)
        o_ref[...] = y.astype(o_ref.dtype)


def linear(x, w, b, *, apply_relu=False, out_dtype=jnp.float32,
           tm=512, tk=512, tn=512):
    """y = x @ w + b (optional fused ReLU).

    bf16 GEMM inputs, f32 accumulation, configurable output dtype.  Padding /
    casting / slicing are skipped when the operands are already lane-aligned and
    bf16 (the hot per-layer LSTM projection path hits the copy-free path).
    """
    M, K = x.shape
    Kw, N = w.shape
    assert K == Kw
    tm = min(tm, _round_up(M, 8))
    tk = min(tk, _round_up(K, 128))
    tn = min(tn, _round_up(N, 128))
    Mp, Kp, Np = _round_up(M, tm), _round_up(K, tk), _round_up(N, tn)

    xp = x if (Mp == M and Kp == K) else jnp.pad(x, ((0, Mp - M), (0, Kp - K)))
    if xp.dtype != jnp.bfloat16:
        xp = xp.astype(jnp.bfloat16)
    wp = w if (Kp == K and Np == N) else jnp.pad(w, ((0, Kp - K), (0, Np - N)))
    if wp.dtype != jnp.bfloat16:
        wp = wp.astype(jnp.bfloat16)
    bp = b.astype(jnp.float32)
    if Np > N:
        bp = jnp.pad(bp, ((0, 0), (0, Np - N)))

    grid = (Mp // tm, Np // tn, Kp // tk)
    out = pl.pallas_call(
        functools.partial(_matmul_kernel, apply_relu=apply_relu),
        out_shape=jax.ShapeDtypeStruct((Mp, Np), out_dtype),
        grid_spec=pltpu.PrefetchScalarGridSpec(
            num_scalar_prefetch=0,
            grid=grid,
            in_specs=[pl.BlockSpec((tm, tk), lambda i, j, k: (i, k)),
                      pl.BlockSpec((tk, tn), lambda i, j, k: (k, j)),
                      pl.BlockSpec((1, tn), lambda i, j, k: (0, j))],
            out_specs=pl.BlockSpec((tm, tn), lambda i, j, k: (i, j)),
            scratch_shapes=[pltpu.VMEM((tm, tn), jnp.float32)]),
        compiler_params=pltpu.CompilerParams(
            dimension_semantics=("parallel", "parallel", "arbitrary"),
            vmem_limit_bytes=_vmem_limit_bytes()),
    )(xp, wp, bp)
    if Mp > M or Np > N:
        out = out[:M, :N]
    return out


# ------------------------- LSTM recurrence (time-chunked grid) -----------------------

def _lstm_recurrence_kernel(xp_ref, whh_ref, len_ref, o_ref, h_sc, c_sc, *,
                            hidden, pad_value, mask_output):
    # xp_ref : (tt, Bp, 4*Hp) bf16  = x @ W_ih + (b_ih + b_hh), streamed per chunk
    # whh_ref: (Hp, 4*Hp)   bf16  = recurrent weights, VMEM-resident across chunks
    # len_ref: (Bp, 1)      int32 = valid downsampled frames per example
    # o_ref  : (tt, Bp, Hp)        = hidden-state output for this time chunk
    # h_sc/c_sc: (Bp, Hp) f32 scratch, persists across grid steps (carries state)
    H = hidden
    tt = xp_ref.shape[0]
    chunk = pl.program_id(0)

    @pl.when(chunk == 0)
    def _():
        h_sc[...] = jnp.zeros_like(h_sc)
        c_sc[...] = jnp.zeros_like(c_sc)

    def step(tl, carry):
        xp_t = xp_ref.at[tl]                       # (Bp, 4*Hp) ref view, zero-cost
        h_bf = h_sc[...].astype(jnp.bfloat16)

        def gate(g):                               # one 128-aligned gate slice
            return (xp_t[:, g * H:(g + 1) * H].astype(jnp.float32)
                    + jnp.dot(h_bf, whh_ref[:, g * H:(g + 1) * H],
                              preferred_element_type=jnp.float32))

        # Per-gate computation folded into c/h immediately (low vreg pressure).
        c_new = jax.nn.sigmoid(gate(1)) * c_sc[...]                    # f * c
        c_new = c_new + jax.nn.sigmoid(gate(0)) * jnp.tanh(gate(2))    # + i * g
        h_new = jax.nn.sigmoid(gate(3)) * jnp.tanh(c_new)              # o * tanh(c)
        c_sc[...] = c_new
        h_sc[...] = h_new

        if mask_output:
            t = chunk * tt + tl
            valid = len_ref[...] > t                                   # (Bp, 1)
            o_ref[tl] = jnp.where(valid, h_new,
                                  jnp.float32(pad_value)).astype(o_ref.dtype)
        else:
            o_ref[tl] = h_new.astype(o_ref.dtype)
        return carry

    jax.lax.fori_loop(0, tt, step, 0)


def lstm_recurrence(xp_tbg, w_hh_bf16, len_b1, *, pad_value, mask_output,
                    out_dtype, tt=8):
    T, Bp, G = xp_tbg.shape
    H = w_hh_bf16.shape[0]
    assert G == 4 * H
    tt = min(tt, T)
    Tp = _round_up(T, tt)
    if Tp > T:                                     # trailing padded frames are
        xp_tbg = jnp.pad(xp_tbg, ((0, Tp - T), (0, 0), (0, 0)))   # sliced off below
    grid = (Tp // tt,)
    out = pl.pallas_call(
        functools.partial(_lstm_recurrence_kernel, hidden=H,
                          pad_value=pad_value, mask_output=mask_output),
        out_shape=jax.ShapeDtypeStruct((Tp, Bp, H), out_dtype),
        grid_spec=pltpu.PrefetchScalarGridSpec(
            num_scalar_prefetch=0,
            grid=grid,
            in_specs=[pl.BlockSpec((tt, Bp, G), lambda t: (t, 0, 0)),
                      pl.BlockSpec((H, G), lambda t: (0, 0)),
                      pl.BlockSpec((Bp, 1), lambda t: (0, 0))],
            out_specs=pl.BlockSpec((tt, Bp, H), lambda t: (t, 0, 0)),
            scratch_shapes=[pltpu.VMEM((Bp, H), jnp.float32),
                            pltpu.VMEM((Bp, H), jnp.float32)]),
        compiler_params=pltpu.CompilerParams(
            dimension_semantics=("arbitrary",),
            vmem_limit_bytes=_vmem_limit_bytes()),
    )(xp_tbg, w_hh_bf16, len_b1)
    if Tp > T:
        out = out[:T]
    return out


# ----------------------------- conv via im2col + tiled GEMM --------------------------

def conv2d_s2_relu(x_nhwc, w_oihw, b_1o):
    """Conv2d(kernel=3, stride=2, no padding) + ReLU; the matmul runs in Pallas.

    Input is cast to bf16 BEFORE building patches so the 9x im2col blow-up is never
    materialized in f32.
    """
    x_nhwc = x_nhwc.astype(jnp.bfloat16)
    B, H, W, Cin = x_nhwc.shape
    Cout = w_oihw.shape[0]
    Ho = (H - 3) // 2 + 1
    Wo = (W - 3) // 2 + 1
    patches = jnp.stack(
        [jnp.stack([x_nhwc[:, kh:kh + 2 * Ho:2, kw:kw + 2 * Wo:2, :]
                    for kw in range(3)], axis=3)
         for kh in range(3)], axis=3)                     # (B, Ho, Wo, kh, kw, Cin)
    patches = patches.reshape(B * Ho * Wo, 9 * Cin)
    w = jnp.transpose(w_oihw, (2, 3, 1, 0)).reshape(9 * Cin, Cout)   # (kh,kw,ci,co)
    y = linear(patches, w, b_1o, apply_relu=True, out_dtype=jnp.bfloat16)
    return y.reshape(B, Ho, Wo, Cout)


# ----------------------------- full forward ------------------------------------------

def lstm_asr_forward(params, x, x_mask, pad_value):
    """x: (B, T, F) f32; x_mask: (B, T) {0,1}; returns (logits (B,T'',V), lengths (B,))."""
    B, T, F = x.shape
    Hp = params['lstm'][0]['w_hh'].shape[0]               # padded hidden (x128)

    # self.sub : Conv2d(1,C,3,2) -> ReLU -> Conv2d(C,C,3,2) -> ReLU
    h = x[:, :, :, None]                                   # NHWC, Cin = 1
    h = conv2d_s2_relu(h, params['conv1_w'], params['conv1_b'])
    h = conv2d_s2_relu(h, params['conv2_w'], params['conv2_b'])
    _, T2, F2, C = h.shape
    # torch: (B,C,T2,F2).transpose(1,2).view(B,T2,C*F2) -> feature order (c, w)
    h = jnp.transpose(h, (0, 1, 3, 2)).reshape(B, T2, C * F2)        # bf16

    # mask downsampling exactly as in torch: [:, :-2:2][:, :-2:2]
    m = x_mask[:, :-2:2][:, :-2:2]                         # (B, T2)
    lengths = jnp.sum(m.astype(jnp.int32), axis=-1)        # get_ctc_pad (assumed)

    # Pad batch to a sublane multiple once; padded rows have length 0.
    Bp = max(8, _round_up(B, 8))
    h = jnp.pad(h, ((0, Bp - B), (0, 0), (0, 0)))
    len_b1 = jnp.pad(lengths, (0, Bp - B))[:, None].astype(jnp.int32)

    # LSTM stack, time-major.  Per layer: one big tiled GEMM for the input
    # projection (bf16 out), then the time-chunked sequential recurrence kernel.
    x_tbd = jnp.transpose(h, (1, 0, 2))                    # (T2, Bp, Din) bf16
    n_layers = len(params['lstm'])
    for l, lw in enumerate(params['lstm']):
        last = (l == n_layers - 1)
        Din_l = x_tbd.shape[-1]
        xp = linear(x_tbd.reshape(T2 * Bp, Din_l), lw['w_ih'], lw['b'],
                    out_dtype=jnp.bfloat16, tm=1024, tk=512, tn=1024)
        xp = xp.reshape(T2, Bp, 4 * Hp)
        x_tbd = lstm_recurrence(
            xp, lw['w_hh'], len_b1, pad_value=pad_value, mask_output=last,
            out_dtype=(jnp.float32 if last else jnp.bfloat16))

    h = jnp.transpose(x_tbd, (1, 0, 2))[:B]                # (B, T2, Hp) f32

    # self.ffd applied to every frame (including pad_value frames), as in torch.
    logits = linear(h.reshape(B * T2, Hp), params['ffd_w'], params['ffd_b'],
                    out_dtype=jnp.float32)
    logits = logits.reshape(B, T2, -1)
    return logits, lengths


# ----------------------------- parameter init (padded layouts) -----------------------

def _pad_gate_cols(w, h, hp):
    """(..., 4*h) -> (..., 4*hp): each PyTorch gate block (i,f,g,o) is placed at
    column offset g*hp and zero-padded to hp so gate slices are 128-lane aligned."""
    parts = []
    for g in range(4):
        blk = w[..., g * h:(g + 1) * h]
        parts.append(jnp.pad(blk, [(0, 0)] * (w.ndim - 1) + [(0, hp - h)]))
    return jnp.concatenate(parts, axis=-1)


def init_params(key, d_model, hide_dim, hp, num_layers, lstm_in, vocab_size):
    ks = jax.random.split(key, 4 + 3 * num_layers + 2)
    scale = 0.1
    params = {
        'conv1_w': scale * jax.random.normal(ks[0], (d_model, 1, 3, 3), jnp.float32),
        'conv1_b': scale * jax.random.normal(ks[1], (1, d_model), jnp.float32),
        'conv2_w': scale * jax.random.normal(ks[2], (d_model, d_model, 3, 3), jnp.float32),
        'conv2_b': scale * jax.random.normal(ks[3], (1, d_model), jnp.float32),
    }
    lstm = []
    for l in range(num_layers):
        din = lstm_in if l == 0 else hide_dim
        din_rows = din if l == 0 else hp            # layers >0 see the padded hidden dim
        k0, k1, k2 = ks[4 + 3 * l:4 + 3 * l + 3]
        w_ih = scale * jax.random.normal(k0, (din, 4 * hide_dim), jnp.float32)
        w_hh = scale * jax.random.normal(k1, (hide_dim, 4 * hide_dim), jnp.float32)
        b = scale * jax.random.normal(k2, (1, 4 * hide_dim), jnp.float32)  # b_ih+b_hh folded
        w_ih_p = jnp.pad(_pad_gate_cols(w_ih, hide_dim, hp), ((0, din_rows - din), (0, 0)))
        w_hh_p = jnp.pad(_pad_gate_cols(w_hh, hide_dim, hp), ((0, hp - hide_dim), (0, 0)))
        b_p = _pad_gate_cols(b, hide_dim, hp)
        lstm.append({'w_ih': w_ih_p.astype(jnp.bfloat16),  # (Din or Hp, 4*Hp) bf16
                     'w_hh': w_hh_p.astype(jnp.bfloat16),  # (Hp, 4*Hp) bf16 (f32 accum)
                     'b': b_p})                            # (1, 4*Hp) f32
    params['lstm'] = lstm
    params['ffd_w'] = jnp.pad(
        scale * jax.random.normal(ks[-2], (hide_dim, vocab_size), jnp.float32),
        ((0, hp - hide_dim), (0, 0))).astype(jnp.bfloat16)  # zero rows for padded hidden
    params['ffd_b'] = scale * jax.random.normal(ks[-1], (1, vocab_size), jnp.float32)
    return params


# ----------------------------- main ---------------------------------------------------

if __name__ == "__main__":
    B, T, F = 2, 16, 16
    d_model, hide_dim, num_layers, vocab_size = 4, 32, 2, 10
    pad_value = -1.0   # the `pad_value` forward arg
    HP = max(128, _round_up(hide_dim, 128))                # lane-aligned hidden size

    key = jax.random.PRNGKey(0)
    kx, kp = jax.random.split(key)
    x = jax.random.normal(kx, (B, T, F), dtype=jnp.float32)
    # sequence lengths: example 0 fully valid, example 1 has 7 valid frames
    valid_frames = jnp.array([16, 7], dtype=jnp.int32)
    x_mask = (jnp.arange(T)[None, :] < valid_frames[:, None]).astype(jnp.float32)

    T1, F1 = (T - 3) // 2 + 1, (F - 3) // 2 + 1
    T2, F2 = (T1 - 3) // 2 + 1, (F1 - 3) // 2 + 1
    lstm_in = d_model * F2   # (9728 in the original checkpoint; derived here)

    params = init_params(kp, d_model, hide_dim, HP, num_layers, lstm_in, vocab_size)

    fwd = jax.jit(functools.partial(lstm_asr_forward, pad_value=pad_value))
    logits, x_pad_len = fwd(params, x, x_mask)
    jax.block_until_ready((logits, x_pad_len))

    assert logits.shape == (B, T2, vocab_size)
    assert x_pad_len.shape == (B,)
    print("KERNEL_OK")
</pallas_src>

<mosaic_0001>
module attributes {stable_mosaic.version = 11 : i64} {
  func.func @_matmul_kernel(%arg0: i32, %arg1: i32, %arg2: i32, %arg3: memref<104x128xbf16, #tpu.memory_space<vmem>>, %arg4: memref<128x128xbf16, #tpu.memory_space<vmem>>, %arg5: memref<1x128xf32, #tpu.memory_space<vmem>>, %arg6: memref<104x128xbf16, #tpu.memory_space<vmem>>, %arg7: memref<104x128xf32, #tpu.memory_space<vmem>>) attributes {dimension_semantics = [#tpu.dimension_semantics<parallel>, #tpu.dimension_semantics<parallel>, #tpu.dimension_semantics<arbitrary>], iteration_bounds = array<i64: 1, 1, 1>, scalar_prefetch = 0 : i64, scratch_operands = 1 : i64, tpu.core_type = #tpu.core_type<tc>, window_params = [{transform_indices = @transform_0, window_bounds = array<i64: 104, 128>}, {transform_indices = @transform_1, window_bounds = array<i64: 128, 128>}, {transform_indices = @transform_2, window_bounds = array<i64: 1, 128>}, {transform_indices = @transform_3, window_bounds = array<i64: 104, 128>}]} {
    %c0_i32 = arith.constant 0 : i32
    %0 = arith.cmpi eq, %arg2, %c0_i32 : i32
    %1 = arith.extui %0 : i1 to i32
    %c0_i32_0 = arith.constant 0 : i32
    %2 = arith.cmpi ne, %1, %c0_i32_0 : i32
    scf.if %2 {
      %cst_10 = arith.constant 0.000000e+00 : f32
      %12 = vector.broadcast %cst_10 : f32 to vector<104x128xf32>
      %c0_11 = arith.constant 0 : index
      %c0_12 = arith.constant 0 : index
      %13 = vector.load %arg7[%c0_11, %c0_12] : memref<104x128xf32, #tpu.memory_space<vmem>>, vector<104x128xf32>
      tpu.vector_store %arg7[%c0_11, %c0_12], %12 {strides = array<i32>} : memref<104x128xf32, #tpu.memory_space<vmem>>, vector<104x128xf32>,
    } else {
    }
    %c0 = arith.constant 0 : index
    %c0_1 = arith.constant 0 : index
    %3 = vector.load %arg7[%c0, %c0_1] : memref<104x128xf32, #tpu.memory_space<vmem>>, vector<104x128xf32>
    %c0_2 = arith.constant 0 : index
    %c0_3 = arith.constant 0 : index
    %4 = vector.load %arg3[%c0_2, %c0_3] : memref<104x128xbf16, #tpu.memory_space<vmem>>, vector<104x128xbf16>
    %c0_4 = arith.constant 0 : index
    %c0_5 = arith.constant 0 : index
    %5 = vector.load %arg4[%c0_4, %c0_5] : memref<128x128xbf16, #tpu.memory_space<vmem>>, vector<128x128xbf16>
    %cst = arith.constant dense<0.000000e+00> : vector<104x128xf32>
    %6 = tpu.matmul %4, %5, %cst {dimension_numbers = #tpu.dot_dimension_numbers<[1], [0], [0], [1], [0, 0, 1, 1], [], []>} : vector<104x128xbf16>, vector<128x128xbf16>, vector<104x128xf32> -> vector<104x128xf32>
    %7 = arith.addf %3, %6 : vector<104x128xf32>
    %c0_6 = arith.constant 0 : index
    %c0_7 = arith.constant 0 : index
    %8 = vector.load %arg7[%c0_6, %c0_7] : memref<104x128xf32, #tpu.memory_space<vmem>>, vector<104x128xf32>
    tpu.vector_store %arg7[%c0_6, %c0_7], %7 {strides = array<i32>} : memref<104x128xf32, #tpu.memory_space<vmem>>, vector<104x128xf32>,
    %c0_i32_8 = arith.constant 0 : i32
    %9 = arith.cmpi eq, %arg2, %c0_i32_8 : i32
    %10 = arith.extui %9 : i1 to i32
    %c0_i32_9 = arith.constant 0 : i32
    %11 = arith.cmpi ne, %10, %c0_i32_9 : i32
    scf.if %11 {
      %c0_10 = arith.constant 0 : index
      %c0_11 = arith.constant 0 : index
      %12 = vector.load %arg7[%c0_10, %c0_11] : memref<104x128xf32, #tpu.memory_space<vmem>>, vector<104x128xf32>
      %c0_12 = arith.constant 0 : index
      %c0_13 = arith.constant 0 : index
      %13 = vector.load %arg5[%c0_12, %c0_13] : memref<1x128xf32, #tpu.memory_space<vmem>>, vector<1x128xf32>
      %14 = vector.broadcast %13 : vector<1x128xf32> to vector<104x128xf32>
      %15 = arith.addf %12, %14 : vector<104x128xf32>
      %cst_14 = arith.constant 0.000000e+00 : f32
      %16 = vector.broadcast %cst_14 : f32 to vector<104x128xf32>
      %17 = arith.maximumf %15, %16 : vector<104x128xf32>
      %18 = arith.truncf %17 : vector<104x128xf32> to vector<104x128xbf16>
      %c0_15 = arith.constant 0 : index
      %c0_16 = arith.constant 0 : index
      %19 = vector.load %arg6[%c0_15, %c0_16] : memref<104x128xbf16, #tpu.memory_space<vmem>>, vector<104x128xbf16>
      tpu.vector_store %arg6[%c0_15, %c0_16], %18 {strides = array<i32>} : memref<104x128xbf16, #tpu.memory_space<vmem>>, vector<104x128xbf16>,
    } else {
    }
    return
  }
  func.func @transform_0(%arg0: i32, %arg1: i32, %arg2: i32) -> (i32, i32) {
    %c0_i32 = arith.constant 0 : i32
    return %arg0, %arg2 : i32, i32
  }
  func.func @transform_1(%arg0: i32, %arg1: i32, %arg2: i32) -> (i32, i32) {
    %c0_i32 = arith.constant 0 : i32
    return %arg2, %arg1 : i32, i32
  }
  func.func @transform_2(%arg0: i32, %arg1: i32, %arg2: i32) -> (i32, i32) {
    %c0_i32 = arith.constant 0 : i32
    %c0_i32_0 = arith.constant 0 : i32
    return %c0_i32, %arg1 : i32, i32
  }
  func.func @transform_3(%arg0: i32, %arg1: i32, %arg2: i32) -> (i32, i32) {
    %c0_i32 = arith.constant 0 : i32
    return %arg0, %arg1 : i32, i32
  }
}

module attributes {stable_mosaic.version = 11 : i64} {
  func.func @_matmul_kernel(%arg0: i32, %arg1: i32, %arg2: i32, %arg3: memref<24x128xbf16, #tpu.memory_space<vmem>>, %arg4: memref<128x128xbf16, #tpu.memory_space<vmem>>, %arg5: memref<1x128xf32, #tpu.memory_space<vmem>>, %arg6: memref<24x128xbf16, #tpu.memory_space<vmem>>, %arg7: memref<24x128xf32, #tpu.memory_space<vmem>>) attributes {dimension_semantics = [#tpu.dimension_semantics<parallel>, #tpu.dimension_semantics<parallel>, #tpu.dimension_semantics<arbitrary>], iteration_bounds = array<i64: 1, 1, 1>, scalar_prefetch = 0 : i64, scratch_operands = 1 : i64, tpu.core_type = #tpu.core_type<tc>, window_params = [{transform_indices = @transform_0, window_bounds = array<i64: 24, 128>}, {transform_indices = @transform_1, window_bounds = array<i64: 128, 128>}, {transform_indices = @transform_2, window_bounds = array<i64: 1, 128>}, {transform_indices = @transform_3, window_bounds = array<i64: 24, 128>}]} {
    %c0_i32 = arith.constant 0 : i32
    %0 = arith.cmpi eq, %arg2, %c0_i32 : i32
    %1 = arith.extui %0 : i1 to i32
    %c0_i32_0 = arith.constant 0 : i32
    %2 = arith.cmpi ne, %1, %c0_i32_0 : i32
    scf.if %2 {
      %cst_10 = arith.constant 0.000000e+00 : f32
      %12 = vector.broadcast %cst_10 : f32 to vector<24x128xf32>
      %c0_11 = arith.constant 0 : index
      %c0_12 = arith.constant 0 : index
      %13 = vector.load %arg7[%c0_11, %c0_12] : memref<24x128xf32, #tpu.memory_space<vmem>>, vector<24x128xf32>
      tpu.vector_store %arg7[%c0_11, %c0_12], %12 {strides = array<i32>} : memref<24x128xf32, #tpu.memory_space<vmem>>, vector<24x128xf32>,
    } else {
    }
    %c0 = arith.constant 0 : index
    %c0_1 = arith.constant 0 : index
    %3 = vector.load %arg7[%c0, %c0_1] : memref<24x128xf32, #tpu.memory_space<vmem>>, vector<24x128xf32>
    %c0_2 = arith.constant 0 : index
    %c0_3 = arith.constant 0 : index
    %4 = vector.load %arg3[%c0_2, %c0_3] : memref<24x128xbf16, #tpu.memory_space<vmem>>, vector<24x128xbf16>
    %c0_4 = arith.constant 0 : index
    %c0_5 = arith.constant 0 : index
    %5 = vector.load %arg4[%c0_4, %c0_5] : memref<128x128xbf16, #tpu.memory_space<vmem>>, vector<128x128xbf16>
    %cst = arith.constant dense<0.000000e+00> : vector<24x128xf32>
    %6 = tpu.matmul %4, %5, %cst {dimension_numbers = #tpu.dot_dimension_numbers<[1], [0], [0], [1], [0, 0, 1, 1], [], []>} : vector<24x128xbf16>, vector<128x128xbf16>, vector<24x128xf32> -> vector<24x128xf32>
    %7 = arith.addf %3, %6 : vector<24x128xf32>
    %c0_6 = arith.constant 0 : index
    %c0_7 = arith.constant 0 : index
    %8 = vector.load %arg7[%c0_6, %c0_7] : memref<24x128xf32, #tpu.memory_space<vmem>>, vector<24x128xf32>
    tpu.vector_store %arg7[%c0_6, %c0_7], %7 {strides = array<i32>} : memref<24x128xf32, #tpu.memory_space<vmem>>, vector<24x128xf32>,
    %c0_i32_8 = arith.constant 0 : i32
    %9 = arith.cmpi eq, %arg2, %c0_i32_8 : i32
    %10 = arith.extui %9 : i1 to i32
    %c0_i32_9 = arith.constant 0 : i32
    %11 = arith.cmpi ne, %10, %c0_i32_9 : i32
    scf.if %11 {
      %c0_10 = arith.constant 0 : index
      %c0_11 = arith.constant 0 : index
      %12 = vector.load %arg7[%c0_10, %c0_11] : memref<24x128xf32, #tpu.memory_space<vmem>>, vector<24x128xf32>
      %c0_12 = arith.constant 0 : index
      %c0_13 = arith.constant 0 : index
      %13 = vector.load %arg5[%c0_12, %c0_13] : memref<1x128xf32, #tpu.memory_space<vmem>>, vector<1x128xf32>
      %14 = vector.broadcast %13 : vector<1x128xf32> to vector<24x128xf32>
      %15 = arith.addf %12, %14 : vector<24x128xf32>
      %cst_14 = arith.constant 0.000000e+00 : f32
      %16 = vector.broadcast %cst_14 : f32 to vector<24x128xf32>
      %17 = arith.maximumf %15, %16 : vector<24x128xf32>
      %18 = arith.truncf %17 : vector<24x128xf32> to vector<24x128xbf16>
      %c0_15 = arith.constant 0 : index
      %c0_16 = arith.constant 0 : index
      %19 = vector.load %arg6[%c0_15, %c0_16] : memref<24x128xbf16, #tpu.memory_space<vmem>>, vector<24x128xbf16>
      tpu.vector_store %arg6[%c0_15, %c0_16], %18 {strides = array<i32>} : memref<24x128xbf16, #tpu.memory_space<vmem>>, vector<24x128xbf16>,
    } else {
    }
    return
  }
  func.func @transform_0(%arg0: i32, %arg1: i32, %arg2: i32) -> (i32, i32) {
    %c0_i32 = arith.constant 0 : i32
    return %arg0, %arg2 : i32, i32
  }
  func.func @transform_1(%arg0: i32, %arg1: i32, %arg2: i32) -> (i32, i32) {
    %c0_i32 = arith.constant 0 : i32
    return %arg2, %arg1 : i32, i32
  }
  func.func @transform_2(%arg0: i32, %arg1: i32, %arg2: i32) -> (i32, i32) {
    %c0_i32 = arith.constant 0 : i32
    %c0_i32_0 = arith.constant 0 : i32
    return %c0_i32, %arg1 : i32, i32
  }
  func.func @transform_3(%arg0: i32, %arg1: i32, %arg2: i32) -> (i32, i32) {
    %c0_i32 = arith.constant 0 : i32
    return %arg0, %arg1 : i32, i32
  }
}

module attributes {stable_mosaic.version = 11 : i64} {
  func.func @_matmul_kernel(%arg0: i32, %arg1: i32, %arg2: i32, %arg3: memref<24x128xbf16, #tpu.memory_space<vmem>>, %arg4: memref<128x512xbf16, #tpu.memory_space<vmem>>, %arg5: memref<1x512xf32, #tpu.memory_space<vmem>>, %arg6: memref<24x512xbf16, #tpu.memory_space<vmem>>, %arg7: memref<24x512xf32, #tpu.memory_space<vmem>>) attributes {dimension_semantics = [#tpu.dimension_semantics<parallel>, #tpu.dimension_semantics<parallel>, #tpu.dimension_semantics<arbitrary>], iteration_bounds = array<i64: 1, 1, 1>, scalar_prefetch = 0 : i64, scratch_operands = 1 : i64, tpu.core_type = #tpu.core_type<tc>, window_params = [{transform_indices = @transform_0, window_bounds = array<i64: 24, 128>}, {transform_indices = @transform_1, window_bounds = array<i64: 128, 512>}, {transform_indices = @transform_2, window_bounds = array<i64: 1, 512>}, {transform_indices = @transform_3, window_bounds = array<i64: 24, 512>}]} {
    %c0_i32 = arith.constant 0 : i32
    %0 = arith.cmpi eq, %arg2, %c0_i32 : i32
    %1 = arith.extui %0 : i1 to i32
    %c0_i32_0 = arith.constant 0 : i32
    %2 = arith.cmpi ne, %1, %c0_i32_0 : i32
    scf.if %2 {
      %cst_10 = arith.constant 0.000000e+00 : f32
      %12 = vector.broadcast %cst_10 : f32 to vector<24x512xf32>
      %c0_11 = arith.constant 0 : index
      %c0_12 = arith.constant 0 : index
      %13 = vector.load %arg7[%c0_11, %c0_12] : memref<24x512xf32, #tpu.memory_space<vmem>>, vector<24x512xf32>
      tpu.vector_store %arg7[%c0_11, %c0_12], %12 {strides = array<i32>} : memref<24x512xf32, #tpu.memory_space<vmem>>, vector<24x512xf32>,
    } else {
    }
    %c0 = arith.constant 0 : index
    %c0_1 = arith.constant 0 : index
    %3 = vector.load %arg7[%c0, %c0_1] : memref<24x512xf32, #tpu.memory_space<vmem>>, vector<24x512xf32>
    %c0_2 = arith.constant 0 : index
    %c0_3 = arith.constant 0 : index
    %4 = vector.load %arg3[%c0_2, %c0_3] : memref<24x128xbf16, #tpu.memory_space<vmem>>, vector<24x128xbf16>
    %c0_4 = arith.constant 0 : index
    %c0_5 = arith.constant 0 : index
    %5 = vector.load %arg4[%c0_4, %c0_5] : memref<128x512xbf16, #tpu.memory_space<vmem>>, vector<128x512xbf16>
    %cst = arith.constant dense<0.000000e+00> : vector<24x512xf32>
    %6 = tpu.matmul %4, %5, %cst {dimension_numbers = #tpu.dot_dimension_numbers<[1], [0], [0], [1], [0, 0, 1, 1], [], []>} : vector<24x128xbf16>, vector<128x512xbf16>, vector<24x512xf32> -> vector<24x512xf32>
    %7 = arith.addf %3, %6 : vector<24x512xf32>
    %c0_6 = arith.constant 0 : index
    %c0_7 = arith.constant 0 : index
    %8 = vector.load %arg7[%c0_6, %c0_7] : memref<24x512xf32, #tpu.memory_space<vmem>>, vector<24x512xf32>
    tpu.vector_store %arg7[%c0_6, %c0_7], %7 {strides = array<i32>} : memref<24x512xf32, #tpu.memory_space<vmem>>, vector<24x512xf32>,
    %c0_i32_8 = arith.constant 0 : i32
    %9 = arith.cmpi eq, %arg2, %c0_i32_8 : i32
    %10 = arith.extui %9 : i1 to i32
    %c0_i32_9 = arith.constant 0 : i32
    %11 = arith.cmpi ne, %10, %c0_i32_9 : i32
    scf.if %11 {
      %c0_10 = arith.constant 0 : index
      %c0_11 = arith.constant 0 : index
      %12 = vector.load %arg7[%c0_10, %c0_11] : memref<24x512xf32, #tpu.memory_space<vmem>>, vector<24x512xf32>
      %c0_12 = arith.constant 0 : index
      %c0_13 = arith.constant 0 : index
      %13 = vector.load %arg5[%c0_12, %c0_13] : memref<1x512xf32, #tpu.memory_space<vmem>>, vector<1x512xf32>
      %14 = vector.broadcast %13 : vector<1x512xf32> to vector<24x512xf32>
      %15 = arith.addf %12, %14 : vector<24x512xf32>
      %16 = arith.truncf %15 : vector<24x512xf32> to vector<24x512xbf16>
      %c0_14 = arith.constant 0 : index
      %c0_15 = arith.constant 0 : index
      %17 = vector.load %arg6[%c0_14, %c0_15] : memref<24x512xbf16, #tpu.memory_space<vmem>>, vector<24x512xbf16>
      tpu.vector_store %arg6[%c0_14, %c0_15], %16 {strides = array<i32>} : memref<24x512xbf16, #tpu.memory_space<vmem>>, vector<24x512xbf16>,
    } else {
    }
    return
  }
  func.func @transform_0(%arg0: i32, %arg1: i32, %arg2: i32) -> (i32, i32) {
    %c0_i32 = arith.constant 0 : i32
    return %arg0, %arg2 : i32, i32
  }
  func.func @transform_1(%arg0: i32, %arg1: i32, %arg2: i32) -> (i32, i32) {
    %c0_i32 = arith.constant 0 : i32
    return %arg2, %arg1 : i32, i32
  }
  func.func @transform_2(%arg0: i32, %arg1: i32, %arg2: i32) -> (i32, i32) {
    %c0_i32 = arith.constant 0 : i32
    %c0_i32_0 = arith.constant 0 : i32
    return %c0_i32, %arg1 : i32, i32
  }
  func.func @transform_3(%arg0: i32, %arg1: i32, %arg2: i32) -> (i32, i32) {
    %c0_i32 = arith.constant 0 : i32
    return %arg0, %arg1 : i32, i32
  }
}

module attributes {stable_mosaic.version = 11 : i64} {
  func.func @_lstm_recurrence_kernel(%arg0: i32, %arg1: memref<3x8x512xbf16, #tpu.memory_space<vmem>>, %arg2: memref<128x512xbf16, #tpu.memory_space<vmem>>, %arg3: memref<8x1xi32, #tpu.memory_space<vmem>>, %arg4: memref<3x8x128xbf16, #tpu.memory_space<vmem>>, %arg5: memref<8x128xf32, #tpu.memory_space<vmem>>, %arg6: memref<8x128xf32, #tpu.memory_space<vmem>>) attributes {dimension_semantics = [#tpu.dimension_semantics<arbitrary>], iteration_bounds = array<i64: 1>, scalar_prefetch = 0 : i64, scratch_operands = 2 : i64, tpu.core_type = #tpu.core_type<tc>, window_params = [{transform_indices = @transform_0, window_bounds = array<i64: 3, 8, 512>}, {pipeline_mode = #tpu.pipeline_mode<synchronous>, transform_indices = @transform_1, window_bounds = array<i64: 128, 512>}, {pipeline_mode = #tpu.pipeline_mode<synchronous>, transform_indices = @transform_2, window_bounds = array<i64: 8, 1>}, {transform_indices = @transform_3, window_bounds = array<i64: 3, 8, 128>}]} {
    %c0_i32 = arith.constant 0 : i32
    %0 = arith.cmpi eq, %arg0, %c0_i32 : i32
    %1 = arith.extui %0 : i1 to i32
    %c0_i32_0 = arith.constant 0 : i32
    %2 = arith.cmpi ne, %1, %c0_i32_0 : i32
    scf.if %2 {
      %cst = arith.constant 0.000000e+00 : f32
      %4 = vector.broadcast %cst : f32 to vector<8x128xf32>
      %c0 = arith.constant 0 : index
      %c0_3 = arith.constant 0 : index
      %5 = vector.load %arg5[%c0, %c0_3] : memref<8x128xf32, #tpu.memory_space<vmem>>, vector<8x128xf32>
      tpu.vector_store %arg5[%c0, %c0_3], %4 {strides = array<i32>} : memref<8x128xf32, #tpu.memory_space<vmem>>, vector<8x128xf32>,
      %cst_4 = arith.constant 0.000000e+00 : f32
      %6 = vector.broadcast %cst_4 : f32 to vector<8x128xf32>
      %c0_5 = arith.constant 0 : index
      %c0_6 = arith.constant 0 : index
      %7 = vector.load %arg6[%c0_5, %c0_6] : memref<8x128xf32, #tpu.memory_space<vmem>>, vector<8x128xf32>
      tpu.vector_store %arg6[%c0_5, %c0_6], %6 {strides = array<i32>} : memref<8x128xf32, #tpu.memory_space<vmem>>, vector<8x128xf32>,
    } else {
    }
    %c0_i32_1 = arith.constant 0 : i32
    %c3_i32 = arith.constant 3 : i32
    %3 = arith.addi %c0_i32_1, %c3_i32 : i32
    %c1_i32 = arith.constant 1 : i32
    scf.for %arg7 = %c0_i32_1 to %3 step %c1_i32  : i32 {
      %c0 = arith.constant 0 : index
      %c0_3 = arith.constant 0 : index
      %4 = vector.load %arg5[%c0, %c0_3] : memref<8x128xf32, #tpu.memory_space<vmem>>, vector<8x128xf32>
      %5 = arith.truncf %4 : vector<8x128xf32> to vector<8x128xbf16>
      %c0_i32_4 = arith.constant 0 : i32
      %c0_i32_5 = arith.constant 0 : i32
      %6 = tpu.memref_slice %arg1[%arg7, %c0_i32_4, %c0_i32_5] : memref<3x8x512xbf16, #tpu.memory_space<vmem>> -> memref<1x8x512xbf16, #tpu.memory_space<vmem>>
      %7 = tpu.memref_squeeze %6 : memref<1x8x512xbf16, #tpu.memory_space<vmem>> -> memref<8x512xbf16, #tpu.memory_space<vmem>>
      %c0_6 = arith.constant 0 : index
      %c128 = arith.constant 128 : index
      %8 = vector.load %7[%c0_6, %c128] : memref<8x512xbf16, #tpu.memory_space<vmem>>, vector<8x128xbf16>
      %9 = arith.extf %8 : vector<8x128xbf16> to vector<8x128xf32>
      %c0_7 = arith.constant 0 : index
      %c128_8 = arith.constant 128 : index
      %10 = vector.load %arg2[%c0_7, %c128_8] : memref<128x512xbf16, #tpu.memory_space<vmem>>, vector<128x128xbf16>
      %cst = arith.constant dense<0.000000e+00> : vector<8x128xf32>
      %11 = tpu.matmul %5, %10, %cst {dimension_numbers = #tpu.dot_dimension_numbers<[1], [0], [0], [1], [0, 0, 1, 1], [], []>} : vector<8x128xbf16>, vector<128x128xbf16>, vector<8x128xf32> -> vector<8x128xf32>
      %12 = arith.addf %9, %11 : vector<8x128xf32>
      %13 = arith.negf %12 : vector<8x128xf32>
      %14 = math.exp %13 : vector<8x128xf32>
      %cst_9 = arith.constant 1.000000e+00 : f32
      %15 = vector.broadcast %cst_9 : f32 to vector<8x128xf32>
      %16 = arith.addf %15, %14 : vector<8x128xf32>
      %17 = arith.divf %15, %16 : vector<8x128xf32>
      %c0_10 = arith.constant 0 : index
      %c0_11 = arith.constant 0 : index
      %18 = vector.load %arg6[%c0_10, %c0_11] : memref<8x128xf32, #tpu.memory_space<vmem>>, vector<8x128xf32>
      %19 = arith.mulf %17, %18 : vector<8x128xf32>
      %c0_i32_12 = arith.constant 0 : i32
      %c0_i32_13 = arith.constant 0 : i32
      %20 = tpu.memref_slice %arg1[%arg7, %c0_i32_12, %c0_i32_13] : memref<3x8x512xbf16, #tpu.memory_space<vmem>> -> memref<1x8x512xbf16, #tpu.memory_space<vmem>>
      %21 = tpu.memref_squeeze %20 : memref<1x8x512xbf16, #tpu.memory_space<vmem>> -> memref<8x512xbf16, #tpu.memory_space<vmem>>
      %c0_14 = arith.constant 0 : index
      %c0_15 = arith.constant 0 : index
      %22 = vector.load %21[%c0_14, %c0_15] : memref<8x512xbf16, #tpu.memory_space<vmem>>, vector<8x128xbf16>
      %23 = arith.extf %22 : vector<8x128xbf16> to vector<8x128xf32>
      %c0_16 = arith.constant 0 : index
      %c0_17 = arith.constant 0 : index
      %24 = vector.load %arg2[%c0_16, %c0_17] : memref<128x512xbf16, #tpu.memory_space<vmem>>, vector<128x128xbf16>
      %cst_18 = arith.constant dense<0.000000e+00> : vector<8x128xf32>
      %25 = tpu.matmul %5, %24, %cst_18 {dimension_numbers = #tpu.dot_dimension_numbers<[1], [0], [0], [1], [0, 0, 1, 1], [], []>} : vector<8x128xbf16>, vector<128x128xbf16>, vector<8x128xf32> -> vector<8x128xf32>
      %26 = arith.addf %23, %25 : vector<8x128xf32>
      %27 = arith.negf %26 : vector<8x128xf32>
      %28 = math.exp %27 : vector<8x128xf32>
      %cst_19 = arith.constant 1.000000e+00 : f32
      %29 = vector.broadcast %cst_19 : f32 to vector<8x128xf32>
      %30 = arith.addf %29, %28 : vector<8x128xf32>
      %31 = arith.divf %29, %30 : vector<8x128xf32>
      %c0_i32_20 = arith.constant 0 : i32
      %c0_i32_21 = arith.constant 0 : i32
      %32 = tpu.memref_slice %arg1[%arg7, %c0_i32_20, %c0_i32_21] : memref<3x8x512xbf16, #tpu.memory_space<vmem>> -> memref<1x8x512xbf16, #tpu.memory_space<vmem>>
      %33 = tpu.memref_squeeze %32 : memref<1x8x512xbf16, #tpu.memory_space<vmem>> -> memref<8x512xbf16, #tpu.memory_space<vmem>>
      %c0_22 = arith.constant 0 : index
      %c256 = arith.constant 256 : index
      %34 = vector.load %33[%c0_22, %c256] : memref<8x512xbf16, #tpu.memory_space<vmem>>, vector<8x128xbf16>
      %35 = arith.extf %34 : vector<8x128xbf16> to vector<8x128xf32>
      %c0_23 = arith.constant 0 : index
      %c256_24 = arith.constant 256 : index
      %36 = vector.load %arg2[%c0_23, %c256_24] : memref<128x512xbf16, #tpu.memory_space<vmem>>, vector<128x128xbf16>
      %cst_25 = arith.constant dense<0.000000e+00> : vector<8x128xf32>
      %37 = tpu.matmul %5, %36, %cst_25 {dimension_numbers = #tpu.dot_dimension_numbers<[1], [0], [0], [1], [0, 0, 1, 1], [], []>} : vector<8x128xbf16>, vector<128x128xbf16>, vector<8x128xf32> -> vector<8x128xf32>
      %38 = arith.addf %35, %37 : vector<8x128xf32>
      %39 = math.tanh %38 : vector<8x128xf32>
      %40 = arith.mulf %31, %39 : vector<8x128xf32>
      %41 = arith.addf %19, %40 : vector<8x128xf32>
      %c0_i32_26 = arith.constant 0 : i32
      %c0_i32_27 = arith.constant 0 : i32
      %42 = tpu.memref_slice %arg1[%arg7, %c0_i32_26, %c0_i32_27] : memref<3x8x512xbf16, #tpu.memory_space<vmem>> -> memref<1x8x512xbf16, #tpu.memory_space<vmem>>
      %43 = tpu.memref_squeeze %42 : memref<1x8x512xbf16, #tpu.memory_space<vmem>> -> memref<8x512xbf16, #tpu.memory_space<vmem>>
      %c0_28 = arith.constant 0 : index
      %c384 = arith.constant 384 : index
      %44 = vector.load %43[%c0_28, %c384] : memref<8x512xbf16, #tpu.memory_space<vmem>>, vector<8x128xbf16>
      %45 = arith.extf %44 : vector<8x128xbf16> to vector<8x128xf32>
      %c0_29 = arith.constant 0 : index
      %c384_30 = arith.constant 384 : index
      %46 = vector.load %arg2[%c0_29, %c384_30] : memref<128x512xbf16, #tpu.memory_space<vmem>>, vector<128x128xbf16>
      %cst_31 = arith.constant dense<0.000000e+00> : vector<8x128xf32>
      %47 = tpu.matmul %5, %46, %cst_31 {dimension_numbers = #tpu.dot_dimension_numbers<[1], [0], [0], [1], [0, 0, 1, 1], [], []>} : vector<8x128xbf16>, vector<128x128xbf16>, vector<8x128xf32> -> vector<8x128xf32>
      %48 = arith.addf %45, %47 : vector<8x128xf32>
      %49 = arith.negf %48 : vector<8x128xf32>
      %50 = math.exp %49 : vector<8x128xf32>
      %cst_32 = arith.constant 1.000000e+00 : f32
      %51 = vector.broadcast %cst_32 : f32 to vector<8x128xf32>
      %52 = arith.addf %51, %50 : vector<8x128xf32>
      %53 = arith.divf %51, %52 : vector<8x128xf32>
      %54 = math.tanh %41 : vector<8x128xf32>
      %55 = arith.mulf %53, %54 : vector<8x128xf32>
      %c0_33 = arith.constant 0 : index
      %c0_34 = arith.constant 0 : index
      %56 = vector.load %arg6[%c0_33, %c0_34] : memref<8x128xf32, #tpu.memory_space<vmem>>, vector<8x128xf32>
      tpu.vector_store %arg6[%c0_33, %c0_34], %41 {strides = array<i32>} : memref<8x128xf32, #tpu.memory_space<vmem>>, vector<8x128xf32>,
      %c0_35 = arith.constant 0 : index
      %c0_36 = arith.constant 0 : index
      %57 = vector.load %arg5[%c0_35, %c0_36] : memref<8x128xf32, #tpu.memory_space<vmem>>, vector<8x128xf32>
      tpu.vector_store %arg5[%c0_35, %c0_36], %55 {strides = array<i32>} : memref<8x128xf32, #tpu.memory_space<vmem>>, vector<8x128xf32>,
      %58 = arith.truncf %55 : vector<8x128xf32> to vector<8x128xbf16>
      %59 = arith.index_cast %arg7 : i32 to index
      %c0_37 = arith.constant 0 : index
      %c0_38 = arith.constant 0 : index
      %60 = vector.load %arg4[%59, %c0_37, %c0_38] : memref<3x8x128xbf16, #tpu.memory_space<vmem>>, vector<1x8x128xbf16>
      %61 = vector.shape_cast %60 : vector<1x8x128xbf16> to vector<8x128xbf16>
      %62 = vector.shape_cast %58 : vector<8x128xbf16> to vector<1x8x128xbf16>
      tpu.vector_store %arg4[%59, %c0_37, %c0_38], %62 {strides = array<i32>} : memref<3x8x128xbf16, #tpu.memory_space<vmem>>, vector<1x8x128xbf16>,
    }
    %c3_i32_2 = arith.constant 3 : i32
    return
  }
  func.func @transform_0(%arg0: i32) -> (i32, i32, i32) {
    %c0_i32 = arith.constant 0 : i32
    %c0_i32_0 = arith.constant 0 : i32
    %c0_i32_1 = arith.constant 0 : i32
    return %arg0, %c0_i32, %c0_i32_0 : i32, i32, i32
  }
  func.func @transform_1(%arg0: i32) -> (i32, i32) {
    %c0_i32 = arith.constant 0 : i32
    %c0_i32_0 = arith.constant 0 : i32
    %c0_i32_1 = arith.constant 0 : i32
    return %c0_i32, %c0_i32_0 : i32, i32
  }
  func.func @transform_2(%arg0: i32) -> (i32, i32) {
    %c0_i32 = arith.constant 0 : i32
    %c0_i32_0 = arith.constant 0 : i32
    %c0_i32_1 = arith.constant 0 : i32
    return %c0_i32, %c0_i32_0 : i32, i32
  }
  func.func @transform_3(%arg0: i32) -> (i32, i32, i32) {
    %c0_i32 = arith.constant 0 : i32
    %c0_i32_0 = arith.constant 0 : i32
    %c0_i32_1 = arith.constant 0 : i32
    return %arg0, %c0_i32, %c0_i32_0 : i32, i32, i32
  }
}

module attributes {stable_mosaic.version = 11 : i64} {
  func.func @_lstm_recurrence_kernel(%arg0: i32, %arg1: memref<3x8x512xbf16, #tpu.memory_space<vmem>>, %arg2: memref<128x512xbf16, #tpu.memory_space<vmem>>, %arg3: memref<8x1xi32, #tpu.memory_space<vmem>>, %arg4: memref<3x8x128xf32, #tpu.memory_space<vmem>>, %arg5: memref<8x128xf32, #tpu.memory_space<vmem>>, %arg6: memref<8x128xf32, #tpu.memory_space<vmem>>) attributes {dimension_semantics = [#tpu.dimension_semantics<arbitrary>], iteration_bounds = array<i64: 1>, scalar_prefetch = 0 : i64, scratch_operands = 2 : i64, tpu.core_type = #tpu.core_type<tc>, window_params = [{transform_indices = @transform_0, window_bounds = array<i64: 3, 8, 512>}, {pipeline_mode = #tpu.pipeline_mode<synchronous>, transform_indices = @transform_1, window_bounds = array<i64: 128, 512>}, {pipeline_mode = #tpu.pipeline_mode<synchronous>, transform_indices = @transform_2, window_bounds = array<i64: 8, 1>}, {transform_indices = @transform_3, window_bounds = array<i64: 3, 8, 128>}]} {
    %c0_i32 = arith.constant 0 : i32
    %0 = arith.cmpi eq, %arg0, %c0_i32 : i32
    %1 = arith.extui %0 : i1 to i32
    %c0_i32_0 = arith.constant 0 : i32
    %2 = arith.cmpi ne, %1, %c0_i32_0 : i32
    scf.if %2 {
      %cst = arith.constant 0.000000e+00 : f32
      %4 = vector.broadcast %cst : f32 to vector<8x128xf32>
      %c0 = arith.constant 0 : index
      %c0_3 = arith.constant 0 : index
      %5 = vector.load %arg5[%c0, %c0_3] : memref<8x128xf32, #tpu.memory_space<vmem>>, vector<8x128xf32>
      tpu.vector_store %arg5[%c0, %c0_3], %4 {strides = array<i32>} : memref<8x128xf32, #tpu.memory_space<vmem>>, vector<8x128xf32>,
      %cst_4 = arith.constant 0.000000e+00 : f32
      %6 = vector.broadcast %cst_4 : f32 to vector<8x128xf32>
      %c0_5 = arith.constant 0 : index
      %c0_6 = arith.constant 0 : index
      %7 = vector.load %arg6[%c0_5, %c0_6] : memref<8x128xf32, #tpu.memory_space<vmem>>, vector<8x128xf32>
      tpu.vector_store %arg6[%c0_5, %c0_6], %6 {strides = array<i32>} : memref<8x128xf32, #tpu.memory_space<vmem>>, vector<8x128xf32>,
    } else {
    }
    %c0_i32_1 = arith.constant 0 : i32
    %c3_i32 = arith.constant 3 : i32
    %3 = arith.addi %c0_i32_1, %c3_i32 : i32
    %c1_i32 = arith.constant 1 : i32
    scf.for %arg7 = %c0_i32_1 to %3 step %c1_i32  : i32 {
      %c0 = arith.constant 0 : index
      %c0_3 = arith.constant 0 : index
      %4 = vector.load %arg5[%c0, %c0_3] : memref<8x128xf32, #tpu.memory_space<vmem>>, vector<8x128xf32>
      %5 = arith.truncf %4 : vector<8x128xf32> to vector<8x128xbf16>
      %c0_i32_4 = arith.constant 0 : i32
      %c0_i32_5 = arith.constant 0 : i32
      %6 = tpu.memref_slice %arg1[%arg7, %c0_i32_4, %c0_i32_5] : memref<3x8x512xbf16, #tpu.memory_space<vmem>> -> memref<1x8x512xbf16, #tpu.memory_space<vmem>>
      %7 = tpu.memref_squeeze %6 : memref<1x8x512xbf16, #tpu.memory_space<vmem>> -> memref<8x512xbf16, #tpu.memory_space<vmem>>
      %c0_6 = arith.constant 0 : index
      %c128 = arith.constant 128 : index
      %8 = vector.load %7[%c0_6, %c128] : memref<8x512xbf16, #tpu.memory_space<vmem>>, vector<8x128xbf16>
      %9 = arith.extf %8 : vector<8x128xbf16> to vector<8x128xf32>
      %c0_7 = arith.constant 0 : index
      %c128_8 = arith.constant 128 : index
      %10 = vector.load %arg2[%c0_7, %c128_8] : memref<128x512xbf16, #tpu.memory_space<vmem>>, vector<128x128xbf16>
      %cst = arith.constant dense<0.000000e+00> : vector<8x128xf32>
      %11 = tpu.matmul %5, %10, %cst {dimension_numbers = #tpu.dot_dimension_numbers<[1], [0], [0], [1], [0, 0, 1, 1], [], []>} : vector<8x128xbf16>, vector<128x128xbf16>, vector<8x128xf32> -> vector<8x128xf32>
      %12 = arith.addf %9, %11 : vector<8x128xf32>
      %13 = arith.negf %12 : vector<8x128xf32>
      %14 = math.exp %13 : vector<8x128xf32>
      %cst_9 = arith.constant 1.000000e+00 : f32
      %15 = vector.broadcast %cst_9 : f32 to vector<8x128xf32>
      %16 = arith.addf %15, %14 : vector<8x128xf32>
      %17 = arith.divf %15, %16 : vector<8x128xf32>
      %c0_10 = arith.constant 0 : index
      %c0_11 = arith.constant 0 : index
      %18 = vector.load %arg6[%c0_10, %c0_11] : memref<8x128xf32, #tpu.memory_space<vmem>>, vector<8x128xf32>
      %19 = arith.mulf %17, %18 : vector<8x128xf32>
      %c0_i32_12 = arith.constant 0 : i32
      %c0_i32_13 = arith.constant 0 : i32
      %20 = tpu.memref_slice %arg1[%arg7, %c0_i32_12, %c0_i32_13] : memref<3x8x512xbf16, #tpu.memory_space<vmem>> -> memref<1x8x512xbf16, #tpu.memory_space<vmem>>
      %21 = tpu.memref_squeeze %20 : memref<1x8x512xbf16, #tpu.memory_space<vmem>> -> memref<8x512xbf16, #tpu.memory_space<vmem>>
      %c0_14 = arith.constant 0 : index
      %c0_15 = arith.constant 0 : index
      %22 = vector.load %21[%c0_14, %c0_15] : memref<8x512xbf16, #tpu.memory_space<vmem>>, vector<8x128xbf16>
      %23 = arith.extf %22 : vector<8x128xbf16> to vector<8x128xf32>
      %c0_16 = arith.constant 0 : index
      %c0_17 = arith.constant 0 : index
      %24 = vector.load %arg2[%c0_16, %c0_17] : memref<128x512xbf16, #tpu.memory_space<vmem>>, vector<128x128xbf16>
      %cst_18 = arith.constant dense<0.000000e+00> : vector<8x128xf32>
      %25 = tpu.matmul %5, %24, %cst_18 {dimension_numbers = #tpu.dot_dimension_numbers<[1], [0], [0], [1], [0, 0, 1, 1], [], []>} : vector<8x128xbf16>, vector<128x128xbf16>, vector<8x128xf32> -> vector<8x128xf32>
      %26 = arith.addf %23, %25 : vector<8x128xf32>
      %27 = arith.negf %26 : vector<8x128xf32>
      %28 = math.exp %27 : vector<8x128xf32>
      %cst_19 = arith.constant 1.000000e+00 : f32
      %29 = vector.broadcast %cst_19 : f32 to vector<8x128xf32>
      %30 = arith.addf %29, %28 : vector<8x128xf32>
      %31 = arith.divf %29, %30 : vector<8x128xf32>
      %c0_i32_20 = arith.constant 0 : i32
      %c0_i32_21 = arith.constant 0 : i32
      %32 = tpu.memref_slice %arg1[%arg7, %c0_i32_20, %c0_i32_21] : memref<3x8x512xbf16, #tpu.memory_space<vmem>> -> memref<1x8x512xbf16, #tpu.memory_space<vmem>>
      %33 = tpu.memref_squeeze %32 : memref<1x8x512xbf16, #tpu.memory_space<vmem>> -> memref<8x512xbf16, #tpu.memory_space<vmem>>
      %c0_22 = arith.constant 0 : index
      %c256 = arith.constant 256 : index
      %34 = vector.load %33[%c0_22, %c256] : memref<8x512xbf16, #tpu.memory_space<vmem>>, vector<8x128xbf16>
      %35 = arith.extf %34 : vector<8x128xbf16> to vector<8x128xf32>
      %c0_23 = arith.constant 0 : index
      %c256_24 = arith.constant 256 : index
      %36 = vector.load %arg2[%c0_23, %c256_24] : memref<128x512xbf16, #tpu.memory_space<vmem>>, vector<128x128xbf16>
      %cst_25 = arith.constant dense<0.000000e+00> : vector<8x128xf32>
      %37 = tpu.matmul %5, %36, %cst_25 {dimension_numbers = #tpu.dot_dimension_numbers<[1], [0], [0], [1], [0, 0, 1, 1], [], []>} : vector<8x128xbf16>, vector<128x128xbf16>, vector<8x128xf32> -> vector<8x128xf32>
      %38 = arith.addf %35, %37 : vector<8x128xf32>
      %39 = math.tanh %38 : vector<8x128xf32>
      %40 = arith.mulf %31, %39 : vector<8x128xf32>
      %41 = arith.addf %19, %40 : vector<8x128xf32>
      %c0_i32_26 = arith.constant 0 : i32
      %c0_i32_27 = arith.constant 0 : i32
      %42 = tpu.memref_slice %arg1[%arg7, %c0_i32_26, %c0_i32_27] : memref<3x8x512xbf16, #tpu.memory_space<vmem>> -> memref<1x8x512xbf16, #tpu.memory_space<vmem>>
      %43 = tpu.memref_squeeze %42 : memref<1x8x512xbf16, #tpu.memory_space<vmem>> -> memref<8x512xbf16, #tpu.memory_space<vmem>>
      %c0_28 = arith.constant 0 : index
      %c384 = arith.constant 384 : index
      %44 = vector.load %43[%c0_28, %c384] : memref<8x512xbf16, #tpu.memory_space<vmem>>, vector<8x128xbf16>
      %45 = arith.extf %44 : vector<8x128xbf16> to vector<8x128xf32>
      %c0_29 = arith.constant 0 : index
      %c384_30 = arith.constant 384 : index
      %46 = vector.load %arg2[%c0_29, %c384_30] : memref<128x512xbf16, #tpu.memory_space<vmem>>, vector<128x128xbf16>
      %cst_31 = arith.constant dense<0.000000e+00> : vector<8x128xf32>
      %47 = tpu.matmul %5, %46, %cst_31 {dimension_numbers = #tpu.dot_dimension_numbers<[1], [0], [0], [1], [0, 0, 1, 1], [], []>} : vector<8x128xbf16>, vector<128x128xbf16>, vector<8x128xf32> -> vector<8x128xf32>
      %48 = arith.addf %45, %47 : vector<8x128xf32>
      %49 = arith.negf %48 : vector<8x128xf32>
      %50 = math.exp %49 : vector<8x128xf32>
      %cst_32 = arith.constant 1.000000e+00 : f32
      %51 = vector.broadcast %cst_32 : f32 to vector<8x128xf32>
      %52 = arith.addf %51, %50 : vector<8x128xf32>
      %53 = arith.divf %51, %52 : vector<8x128xf32>
      %54 = math.tanh %41 : vector<8x128xf32>
      %55 = arith.mulf %53, %54 : vector<8x128xf32>
      %c0_33 = arith.constant 0 : index
      %c0_34 = arith.constant 0 : index
      %56 = vector.load %arg6[%c0_33, %c0_34] : memref<8x128xf32, #tpu.memory_space<vmem>>, vector<8x128xf32>
      tpu.vector_store %arg6[%c0_33, %c0_34], %41 {strides = array<i32>} : memref<8x128xf32, #tpu.memory_space<vmem>>, vector<8x128xf32>,
      %c0_35 = arith.constant 0 : index
      %c0_36 = arith.constant 0 : index
      %57 = vector.load %arg5[%c0_35, %c0_36] : memref<8x128xf32, #tpu.memory_space<vmem>>, vector<8x128xf32>
      tpu.vector_store %arg5[%c0_35, %c0_36], %55 {strides = array<i32>} : memref<8x128xf32, #tpu.memory_space<vmem>>, vector<8x128xf32>,
      %c3_i32_37 = arith.constant 3 : i32
      %58 = arith.muli %arg0, %c3_i32_37 : i32
      %59 = arith.addi %58, %arg7 : i32
      %c0_38 = arith.constant 0 : index
      %c0_39 = arith.constant 0 : index
      %60 = vector.load %arg3[%c0_38, %c0_39] : memref<8x1xi32, #tpu.memory_space<vmem>>, vector<8x1xi32>
      %61 = vector.broadcast %59 : i32 to vector<8x1xi32>
      %62 = arith.cmpi sgt, %60, %61 : vector<8x1xi32>
      %cst_40 = arith.constant -1.000000e+00 : f32
      %63 = vector.shape_cast %62 : vector<8x1xi1> to vector<8x1xi1>
      %64 = vector.broadcast %63 : vector<8x1xi1> to vector<8x128xi1>
      %65 = vector.broadcast %cst_40 : f32 to vector<8x128xf32>
      %66 = arith.select %64, %55, %65 : vector<8x128xi1>, vector<8x128xf32>
      %67 = arith.index_cast %arg7 : i32 to index
      %c0_41 = arith.constant 0 : index
      %c0_42 = arith.constant 0 : index
      %68 = vector.load %arg4[%67, %c0_41, %c0_42] : memref<3x8x128xf32, #tpu.memory_space<vmem>>, vector<1x8x128xf32>
      %69 = vector.shape_cast %68 : vector<1x8x128xf32> to vector<8x128xf32>
      %70 = vector.shape_cast %66 : vector<8x128xf32> to vector<1x8x128xf32>
      tpu.vector_store %arg4[%67, %c0_41, %c0_42], %70 {strides = array<i32>} : memref<3x8x128xf32, #tpu.memory_space<vmem>>, vector<1x8x128xf32>,
    }
    %c3_i32_2 = arith.constant 3 : i32
    return
  }
  func.func @transform_0(%arg0: i32) -> (i32, i32, i32) {
    %c0_i32 = arith.constant 0 : i32
    %c0_i32_0 = arith.constant 0 : i32
    %c0_i32_1 = arith.constant 0 : i32
    return %arg0, %c0_i32, %c0_i32_0 : i32, i32, i32
  }
  func.func @transform_1(%arg0: i32) -> (i32, i32) {
    %c0_i32 = arith.constant 0 : i32
    %c0_i32_0 = arith.constant 0 : i32
    %c0_i32_1 = arith.constant 0 : i32
    return %c0_i32, %c0_i32_0 : i32, i32
  }
  func.func @transform_2(%arg0: i32) -> (i32, i32) {
    %c0_i32 = arith.constant 0 : i32
    %c0_i32_0 = arith.constant 0 : i32
    %c0_i32_1 = arith.constant 0 : i32
    return %c0_i32, %c0_i32_0 : i32, i32
  }
  func.func @transform_3(%arg0: i32) -> (i32, i32, i32) {
    %c0_i32 = arith.constant 0 : i32
    %c0_i32_0 = arith.constant 0 : i32
    %c0_i32_1 = arith.constant 0 : i32
    return %arg0, %c0_i32, %c0_i32_0 : i32, i32, i32
  }
}

module attributes {stable_mosaic.version = 11 : i64} {
  func.func @_matmul_kernel(%arg0: i32, %arg1: i32, %arg2: i32, %arg3: memref<8x128xbf16, #tpu.memory_space<vmem>>, %arg4: memref<128x128xbf16, #tpu.memory_space<vmem>>, %arg5: memref<1x128xf32, #tpu.memory_space<vmem>>, %arg6: memref<8x128xf32, #tpu.memory_space<vmem>>, %arg7: memref<8x128xf32, #tpu.memory_space<vmem>>) attributes {dimension_semantics = [#tpu.dimension_semantics<parallel>, #tpu.dimension_semantics<parallel>, #tpu.dimension_semantics<arbitrary>], iteration_bounds = array<i64: 1, 1, 1>, scalar_prefetch = 0 : i64, scratch_operands = 1 : i64, tpu.core_type = #tpu.core_type<tc>, window_params = [{transform_indices = @transform_0, window_bounds = array<i64: 8, 128>}, {transform_indices = @transform_1, window_bounds = array<i64: 128, 128>}, {transform_indices = @transform_2, window_bounds = array<i64: 1, 128>}, {transform_indices = @transform_3, window_bounds = array<i64: 8, 128>}]} {
    %c0_i32 = arith.constant 0 : i32
    %0 = arith.cmpi eq, %arg2, %c0_i32 : i32
    %1 = arith.extui %0 : i1 to i32
    %c0_i32_0 = arith.constant 0 : i32
    %2 = arith.cmpi ne, %1, %c0_i32_0 : i32
    scf.if %2 {
      %cst_10 = arith.constant 0.000000e+00 : f32
      %12 = vector.broadcast %cst_10 : f32 to vector<8x128xf32>
      %c0_11 = arith.constant 0 : index
      %c0_12 = arith.constant 0 : index
      %13 = vector.load %arg7[%c0_11, %c0_12] : memref<8x128xf32, #tpu.memory_space<vmem>>, vector<8x128xf32>
      tpu.vector_store %arg7[%c0_11, %c0_12], %12 {strides = array<i32>} : memref<8x128xf32, #tpu.memory_space<vmem>>, vector<8x128xf32>,
    } else {
    }
    %c0 = arith.constant 0 : index
    %c0_1 = arith.constant 0 : index
    %3 = vector.load %arg7[%c0, %c0_1] : memref<8x128xf32, #tpu.memory_space<vmem>>, vector<8x128xf32>
    %c0_2 = arith.constant 0 : index
    %c0_3 = arith.constant 0 : index
    %4 = vector.load %arg3[%c0_2, %c0_3] : memref<8x128xbf16, #tpu.memory_space<vmem>>, vector<8x128xbf16>
    %c0_4 = arith.constant 0 : index
    %c0_5 = arith.constant 0 : index
    %5 = vector.load %arg4[%c0_4, %c0_5] : memref<128x128xbf16, #tpu.memory_space<vmem>>, vector<128x128xbf16>
    %cst = arith.constant dense<0.000000e+00> : vector<8x128xf32>
    %6 = tpu.matmul %4, %5, %cst {dimension_numbers = #tpu.dot_dimension_numbers<[1], [0], [0], [1], [0, 0, 1, 1], [], []>} : vector<8x128xbf16>, vector<128x128xbf16>, vector<8x128xf32> -> vector<8x128xf32>
    %7 = arith.addf %3, %6 : vector<8x128xf32>
    %c0_6 = arith.constant 0 : index
    %c0_7 = arith.constant 0 : index
    %8 = vector.load %arg7[%c0_6, %c0_7] : memref<8x128xf32, #tpu.memory_space<vmem>>, vector<8x128xf32>
    tpu.vector_store %arg7[%c0_6, %c0_7], %7 {strides = array<i32>} : memref<8x128xf32, #tpu.memory_space<vmem>>, vector<8x128xf32>,
    %c0_i32_8 = arith.constant 0 : i32
    %9 = arith.cmpi eq, %arg2, %c0_i32_8 : i32
    %10 = arith.extui %9 : i1 to i32
    %c0_i32_9 = arith.constant 0 : i32
    %11 = arith.cmpi ne, %10, %c0_i32_9 : i32
    scf.if %11 {
      %c0_10 = arith.constant 0 : index
      %c0_11 = arith.constant 0 : index
      %12 = vector.load %arg7[%c0_10, %c0_11] : memref<8x128xf32, #tpu.memory_space<vmem>>, vector<8x128xf32>
      %c0_12 = arith.constant 0 : index
      %c0_13 = arith.constant 0 : index
      %13 = vector.load %arg5[%c0_12, %c0_13] : memref<1x128xf32, #tpu.memory_space<vmem>>, vector<1x128xf32>
      %14 = vector.broadcast %13 : vector<1x128xf32> to vector<8x128xf32>
      %15 = arith.addf %12, %14 : vector<8x128xf32>
      %c0_14 = arith.constant 0 : index
      %c0_15 = arith.constant 0 : index
      %16 = vector.load %arg6[%c0_14, %c0_15] : memref<8x128xf32, #tpu.memory_space<vmem>>, vector<8x128xf32>
      tpu.vector_store %arg6[%c0_14, %c0_15], %15 {strides = array<i32>} : memref<8x128xf32, #tpu.memory_space<vmem>>, vector<8x128xf32>,
    } else {
    }
    return
  }
  func.func @transform_0(%arg0: i32, %arg1: i32, %arg2: i32) -> (i32, i32) {
    %c0_i32 = arith.constant 0 : i32
    return %arg0, %arg2 : i32, i32
  }
  func.func @transform_1(%arg0: i32, %arg1: i32, %arg2: i32) -> (i32, i32) {
    %c0_i32 = arith.constant 0 : i32
    return %arg2, %arg1 : i32, i32
  }
  func.func @transform_2(%arg0: i32, %arg1: i32, %arg2: i32) -> (i32, i32) {
    %c0_i32 = arith.constant 0 : i32
    %c0_i32_0 = arith.constant 0 : i32
    return %c0_i32, %arg1 : i32, i32
  }
  func.func @transform_3(%arg0: i32, %arg1: i32, %arg2: i32) -> (i32, i32) {
    %c0_i32 = arith.constant 0 : i32
    return %arg0, %arg1 : i32, i32
  }
}

</mosaic_0001>

<bundles_post_ra>
// kernel: lstm_asr_forward.7
= control target key start
LH: loop header
LB: loop body
LE: loop exit
PB: predicated region body
PF: predicated region fallthrough
CT: control target
= control target key end

     0   :  { %v564_v0 = vmov 0.0   ;;  %vm565_vm0 = vmmov 0   ;;  %s677_s1 = inlined_call_operand.vmem [shape: bf16[128,128], index: 1, kind: input, shape index: {}]   ;;  %s678_s0 = inlined_call_operand.vmem [shape: bf16[104,128], index: 0, kind: input, shape index: {}]   ;;  %s679_s2 = inlined_call_operand.vmem [shape: f32[1,128], index: 2, kind: input, shape index: {}]   ;;  %s680_s3 = inlined_call_operand.vmem [shape: bf16[104,128], index: 3, kind: output, shape index: {}]  }
   0x1   :  { %487 = vmatprep.subr.bf16.mxu0 %v564_v0  ;;  %v549_v1 = vld [vmem:[%s677_s1 + $0x38] sm:$0xff]   ;;  %531 = vmatprep.subr.bf16.mxu1 %v564_v0  ;;  %v550_v2 = vld [vmem:[%s677_s1 + $0x30] sm:$0xff]   ;;  %v551_v3 = vld [vmem:[%s677_s1 + $0x28] sm:$0xff]  }
   0x2   :  { %503 = vmatprep.mubr.msk.bf16.mxu0 %vm565_vm0, %v564_v0  ;;  %519 = vmatprep.mubr.msk.bf16.mxu1 %vm565_vm0, %v564_v0  ;;  %v552_v4 = vld [vmem:[%s677_s1 + $0x20] sm:$0xff]   ;;  %v553_v5 = vld [vmem:[%s677_s1 + $0x18] sm:$0xff]   ;;  %v554_v6 = vld [vmem:[%s677_s1 + $0x10] sm:$0xff]  }
   0x3   :  { %488 = vmatpush3.bf16.msra.mxu0 %v549_v1  ;;  %539 = vmatpush3.bf16.msra.mxu1 %v549_v1  ;;  %v555_v7 = vld [vmem:[%s677_s1 + $0x8] sm:$0xff]   ;;  %v556_v8 = vld [vmem:[%s677_s1] sm:$0xff]   ;;  %v561_v13 = vld [vmem:[%s678_s0 + $0x10] sm:$0xff]  }
   0x4   :  { %489 = vmatprep.subr.bf16.mxu0 %v564_v0  ;;  %532 = vmatprep.subr.bf16.mxu1 %v564_v0  ;;  %v557_v9 = vld [vmem:[%s678_s0] sm:$0xff]   ;;  %v559_v11 = vld [vmem:[%s678_s0 + $0x8] sm:$0xff]   ;;  %v562_v14 = vld [vmem:[%s678_s0 + $0x30] ss:$0 sps:$4 sm:$0xff]  }
   0x5   :  { %v558_v10 = vld [vmem:[%s678_s0 + $0x20] sm:$0xff]   ;;  %v560_v12 = vld [vmem:[%s678_s0 + $0x28] sm:$0xff]   ;;  %v563_v15 = vld [vmem:[%s678_s0 + $0x18] sm:$0xff]  }
   0x6   :  { %v641_v17 = vld [vmem:[%s679_s2] ss:$0 sm:$0xff] }
   0x7   :  { %490 = vmatpush3.bf16.msra.mxu0 %v550_v2  ;;  %540 = vmatpush3.bf16.msra.mxu1 %v550_v2 }
   0x8   :  { %491 = vmatprep.subr.bf16.mxu0 %v564_v0  ;;  %533 = vmatprep.subr.bf16.mxu1 %v564_v0 }
   0xb   :  { %492 = vmatpush3.bf16.msra.mxu0 %v551_v3  ;;  %541 = vmatpush3.bf16.msra.mxu1 %v551_v3 }
   0xc   :  { %493 = vmatprep.subr.bf16.mxu0 %v564_v0  ;;  %534 = vmatprep.subr.bf16.mxu1 %v564_v0 }
   0xf   :  { %494 = vmatpush3.bf16.msra.mxu0 %v552_v4  ;;  %542 = vmatpush3.bf16.msra.mxu1 %v552_v4 }
  0x10   :  { %495 = vmatprep.subr.bf16.mxu0 %v564_v0  ;;  %535 = vmatprep.subr.bf16.mxu1 %v564_v0 }
  0x13   :  { %496 = vmatpush3.bf16.msra.mxu0 %v553_v5  ;;  %543 = vmatpush3.bf16.msra.mxu1 %v553_v5 }
  0x14   :  { %497 = vmatprep.subr.bf16.mxu0 %v564_v0  ;;  %536 = vmatprep.subr.bf16.mxu1 %v564_v0 }
  0x17   :  { %498 = vmatpush3.bf16.msra.mxu0 %v554_v6  ;;  %544 = vmatpush3.bf16.msra.mxu1 %v554_v6 }
  0x18   :  { %499 = vmatprep.subr.bf16.mxu0 %v564_v0  ;;  %537 = vmatprep.subr.bf16.mxu1 %v564_v0 }
  0x1b   :  { %500 = vmatpush3.bf16.msra.mxu0 %v555_v7  ;;  %545 = vmatpush3.bf16.msra.mxu1 %v555_v7 }
  0x1c   :  { %501 = vmatprep.subr.bf16.mxu0 %v564_v0  ;;  %538 = vmatprep.subr.bf16.mxu1 %v564_v0 }
  0x1f   :  { %502 = vmatpush3.bf16.msra.mxu0 %v556_v8  ;;  %546 = vmatpush3.bf16.msra.mxu1 %v556_v8 }
  0x22   :  { %504 = vmatmul.mubr.bf16.vlgmr.msra.gmra.mxu0 %v557_v9  ;;  %520 = vmatmul.mubr.bf16.vlgmr.msra.gmra.mxu1 %v558_v10 }
  0x23   :  { %507 = vmatprep.mubr.msk.bf16.mxu0 %vm565_vm0, %v564_v0  ;;  %523 = vmatprep.mubr.msk.bf16.mxu1 %vm565_vm0, %v564_v0 }
  0x2a   :  { %508 = vmatmul.mubr.bf16.gmra.mxu0 %v559_v11  ;;  %524 = vmatmul.mubr.bf16.gmra.mxu1 %v560_v12 }
  0x2b   :  { %511 = vmatprep.mubr.msk.bf16.mxu0 %vm565_vm0, %v564_v0  ;;  %527 = vmatprep.mubr.msk.bf16.mxu1 %vm565_vm0, %v564_v0 }
  0x32   :  { %512 = vmatmul.mubr.bf16.gmra.mxu0 %v561_v13  ;;  %528 = vmatmul.mubr.bf16.gmra.mxu1 %v562_v14 }
  0x33   :  { %515 = vmatprep.mubr.msk.bf16.mxu0 %vm565_vm0, %v564_v0 }
  0x3a   :  { %516 = vmatmul.mubr.bf16.gmra.mxu0 %v563_v15 }
  0xe2   :  { %v196_v16 = vpop.f32.mrf.mxu0  ;;  %v228_v18 = vpop.f32.mrf.mxu1 }
  0xe3   :  { %v307_v19 = vadd.f32 %v641_v17, %v228_v18  ;;  %v299_v22 = vadd.f32 %v641_v17, %v196_v16 }
  0xe4   :  { %v505_v20 = vpop.f32.mrf.mxu0  ;;  %v521_v21 = vpop.f32.mrf.mxu1 }
  0xe5   :  { %v320_v26 = vmax.f32 %v307_v19, 0.0  ;;  %v312_v30 = vmax.f32 %v299_v22, 0.0 }
  0xe6   :  { %v199_v23 = vpop.f32.mrf.mxu0  ;;  %v231_v24 = vpop.f32.mrf.mxu1 }
  0xe7   :  { %v300_v25 = vadd.f32 %v641_v17, %v199_v23  ;;  %v308_v27 = vadd.f32 %v641_v17, %v231_v24 }
  0xe8   :  { %v506_v28 = vpop.f32.mrf.mxu0  ;;  %v522_v29 = vpop.f32.mrf.mxu1 }
  0xe9   :  { %v313_v31 = vmax.f32 %v300_v25, 0.0  ;;  %v321_v32 = vmax.f32 %v308_v27, 0.0 }
  0xea   :  { %v204_v33 = vpop.f32.mrf.mxu0  ;;  %v236_v34 = vpop.f32.mrf.mxu1 }
  0xeb   :  { %v440_v35 = vpack.c.bf16 %v313_v31, %v312_v30  ;;  %v460_v36 = vpack.c.bf16 %v321_v32, %v320_v26  ;;  %v309_v37 = vadd.f32 %v641_v17, %v236_v34  ;;  %v301_v40 = vadd.f32 %v641_v17, %v204_v33 }
  0xec   :  { %v509_v38 = vpop.f32.mrf.mxu0  ;;  %v525_v39 = vpop.f32.mrf.mxu1 }
  0xed   :  { %441 = vst [vmem:[%s680_s3] sm:$0xff] %v440_v35   ;;  %470 = vst [vmem:[%s680_s3 + $0x20] sm:$0xff] %v460_v36   ;;  %v322_v44 = vmax.f32 %v309_v37, 0.0  ;;  %v314_v48 = vmax.f32 %v301_v40, 0.0 }
  0xee   :  { %v207_v41 = vpop.f32.mrf.mxu0  ;;  %v239_v42 = vpop.f32.mrf.mxu1 }
  0xef   :  { %v302_v43 = vadd.f32 %v641_v17, %v207_v41  ;;  %v310_v45 = vadd.f32 %v641_v17, %v239_v42 }
  0xf0   :  { %v510_v46 = vpop.f32.mrf.mxu0  ;;  %v526_v47 = vpop.f32.mrf.mxu1 }
  0xf1   :  { %v315_v49 = vmax.f32 %v302_v43, 0.0  ;;  %v323_v50 = vmax.f32 %v310_v45, 0.0 }
  0xf2   :  { %v212_v51 = vpop.f32.mrf.mxu0  ;;  %v244_v52 = vpop.f32.mrf.mxu1 }
  0xf3   :  { %v445_v53 = vpack.c.bf16 %v315_v49, %v314_v48  ;;  %v465_v54 = vpack.c.bf16 %v323_v50, %v322_v44  ;;  %v311_v55 = vadd.f32 %v641_v17, %v244_v52  ;;  %v303_v58 = vadd.f32 %v641_v17, %v212_v51 }
  0xf4   :  { %v513_v56 = vpop.f32.mrf.mxu0  ;;  %v529_v57 = vpop.f32.mrf.mxu1 }
  0xf5   :  { %467 = vst [vmem:[%s680_s3 + $0x8] sm:$0xff] %v445_v53   ;;  %471 = vst [vmem:[%s680_s3 + $0x28] sm:$0xff] %v465_v54   ;;  %v324_v59 = vmax.f32 %v311_v55, 0.0  ;;  %v316_v2 = vmax.f32 %v303_v58, 0.0 }
  0xf6   :  { %v215_v60 = vpop.f32.mrf.mxu0  ;;  %v247_v61 = vpop.f32.mrf.mxu1 }
  0xf7   :  { %v304_v62 = vadd.f32 %v641_v17, %v215_v60  ;;  %v436_v63 = vpack.c.bf16 %v324_v59, %v324_v59 }
  0xf8   :  { %v514_v0 = vpop.f32.mrf.mxu0  ;;  %v530_v1 = vpop.f32.mrf.mxu1 }
  0xf9   :  { %v317_v3 = vmax.f32 %v304_v62, 0.0  ;;  %390 = vst [vmem:[%s680_s3 + $0x30] sm:$0xf] %v436_v63 }
  0xfa   :  { %v220_v4 = vpop.f32.mrf.mxu0 }
  0xfb   :  { %v450_v5 = vpack.c.bf16 %v317_v3, %v316_v2  ;;  %v305_v7 = vadd.f32 %v641_v17, %v220_v4 }
  0xfc   :  { %v517_v6 = vpop.f32.mrf.mxu0 }
  0xfd   :  { %468 = vst [vmem:[%s680_s3 + $0x10] sm:$0xff] %v450_v5   ;;  %v318_v11 = vmax.f32 %v305_v7, 0.0 }
  0xfe   :  { %v223_v8 = vpop.f32.mrf.mxu0 }
  0xff   :  { %v306_v9 = vadd.f32 %v641_v17, %v223_v8 }
 0x100   :  { %v518_v10 = vpop.f32.mrf.mxu0 }
 0x101   :  { %v319_v12 = vmax.f32 %v306_v9, 0.0 }
 0x103   :  { %v455_v13 = vpack.c.bf16 %v319_v12, %v318_v11 }
 0x105   :  { %469 = vst [vmem:[%s680_s3 + $0x18] sm:$0xff] %v455_v13  }

// kernel: lstm_asr_forward.8
= control target key start
LH: loop header
LB: loop body
LE: loop exit
PB: predicated region body
PF: predicated region fallthrough
CT: control target
= control target key end

     0   :  { %s316_s1 = inlined_call_operand.vmem [shape: bf16[128,128], index: 1, kind: input, shape index: {}]   ;;  %s317_s0 = inlined_call_operand.vmem [shape: bf16[24,128], index: 0, kind: input, shape index: {}]   ;;  %s318_s2 = inlined_call_operand.vmem [shape: f32[1,128], index: 2, kind: input, shape index: {}]   ;;  %s319_s3 = inlined_call_operand.vmem [shape: bf16[24,128], index: 3, kind: output, shape index: {}]  }
   0x1   :  { %v247_v0 = vld [vmem:[%s316_s1 + $0x38] sm:$0xff]   ;;  %v248_v1 = vld [vmem:[%s316_s1 + $0x30] sm:$0xff]   ;;  %v249_v2 = vld [vmem:[%s316_s1 + $0x28] sm:$0xff]  }
   0x2   :  { %227 = vmatprep.subr.bf16.mxu0 %v247_v0  ;;  %v250_v3 = vld [vmem:[%s316_s1 + $0x20] sm:$0xff]   ;;  %v251_v5 = vld [vmem:[%s316_s1 + $0x18] sm:$0xff]   ;;  %v252_v6 = vld [vmem:[%s316_s1 + $0x10] sm:$0xff]  }
   0x3   :  { %228 = vmatpush3.bf16.msra.mxu0 %v247_v0  ;;  %v255_v4 = vld [vmem:[%s317_s0] sm:$0xff]   ;;  %v253_v7 = vld [vmem:[%s316_s1 + $0x8] sm:$0xff]  }
   0x4   :  { %229 = vmatprep.subr.bf16.mxu0 %v248_v1  ;;  %243 = vmatprep.mubr.bf16.mxu0 %v255_v4  ;;  %v254_v8 = vld [vmem:[%s316_s1] sm:$0xff]   ;;  %v256_v9 = vld [vmem:[%s317_s0 + $0x8] ss:$0 sps:$4 sm:$0xff]  }
   0x5   :  { %v205_v10 = vld [vmem:[%s318_s2] ss:$0 sm:$0xff] }
   0x7   :  { %230 = vmatpush3.bf16.msra.mxu0 %v248_v1 }
   0x8   :  { %231 = vmatprep.subr.bf16.mxu0 %v249_v2 }
   0xb   :  { %232 = vmatpush3.bf16.msra.mxu0 %v249_v2 }
   0xc   :  { %233 = vmatprep.subr.bf16.mxu0 %v250_v3 }
   0xf   :  { %234 = vmatpush3.bf16.msra.mxu0 %v250_v3 }
  0x10   :  { %235 = vmatprep.subr.bf16.mxu0 %v251_v5 }
  0x13   :  { %236 = vmatpush3.bf16.msra.mxu0 %v251_v5 }
  0x14   :  { %237 = vmatprep.subr.bf16.mxu0 %v252_v6 }
  0x17   :  { %238 = vmatpush3.bf16.msra.mxu0 %v252_v6 }
  0x18   :  { %239 = vmatprep.subr.bf16.mxu0 %v253_v7 }
  0x1b   :  { %240 = vmatpush3.bf16.msra.mxu0 %v253_v7 }
  0x1c   :  { %241 = vmatprep.subr.bf16.mxu0 %v254_v8 }
  0x1f   :  { %242 = vmatpush3.bf16.msra.mxu0 %v254_v8 }
  0x22   :  { %244 = vmatmul.mubr.bf16.vlgmr.msra.gmra.mxu0 %v256_v9 }
  0xe2   :  { %v245_v11 = vpop.f32.mrf.mxu0 }
  0xe3   :  { %v171_v12 = vadd.f32 %v245_v11, %v205_v10 }
  0xe4   :  { %v136_v13 = vpop.f32.mrf.mxu0 }
  0xe5   :  { %v174_v14 = vmax.f32 %v171_v12, 0.0  ;;  %v169_v17 = vadd.f32 %v205_v10, %v136_v13 }
  0xe6   :  { %v246_v15 = vpop.f32.mrf.mxu0 }
  0xe7   :  { %v211_v16 = vpack.c.bf16 %v174_v14, %v174_v14  ;;  %v172_v20 = vmax.f32 %v169_v17, 0.0 }
  0xe8   :  { %v139_v18 = vpop.f32.mrf.mxu0 }
  0xe9   :  { %190 = vst [vmem:[%s319_s3 + $0x8] sm:$0xf] %v211_v16  ;;  %v170_v19 = vadd.f32 %v205_v10, %v139_v18 }
  0xeb   :  { %v173_v21 = vmax.f32 %v170_v19, 0.0 }
  0xed   :  { %v215_v22 = vpack.c.bf16 %v173_v21, %v172_v20 }
  0xef   :  { %216 = vst [vmem:[%s319_s3] sm:$0xff] %v215_v22  }

// kernel: lstm_asr_forward.9
= control target key start
LH: loop header
LB: loop body
LE: loop exit
PB: predicated region body
PF: predicated region fallthrough
CT: control target
= control target key end

     0   :  { %v570_v1 = vmov 0   ;;  %v391_v35 = vlaneseq  ;;  %s718_s1 = inlined_call_operand.vmem [shape: bf16[128,512], index: 1, kind: input, shape index: {}]   ;;  %s719_s0 = inlined_call_operand.vmem [shape: bf16[24,128], index: 0, kind: input, shape index: {}]   ;;  %s720_s2 = inlined_call_operand.vmem [shape: f32[1,512], index: 2, kind: input, shape index: {}]   ;;  %s721_s3 = inlined_call_operand.vmem [shape: bf16[24,512], index: 3, kind: output, shape index: {}]  }
   0x1   :  { %v520_v0 = vld [vmem:[%s718_s1 + $0xe4] ss:$16 sps:$4 sm:$0xff]   ;;  %280 = vmatprep.mubr.bf16.mxu0 %v570_v1  ;;  %331 = vmatprep.mubr.bf16.mxu1 %v570_v1  ;;  %v522_v2 = vld [vmem:[%s718_s1 + $0xec] ss:$16 sps:$4 sm:$0xff]   ;;  %v524_v3 = vld [vmem:[%s718_s1 + $0xe0] ss:$16 sps:$4 sm:$0xff]  }
   0x2   :  { %248 = vmatprep.subr.bf16.mxu0 %v520_v0  ;;  %v525_v4 = vld [vmem:[%s718_s1 + $0xe8] ss:$16 sps:$4 sm:$0xff]   ;;  %299 = vmatprep.subr.bf16.mxu1 %v522_v2  ;;  %v526_v5 = vld [vmem:[%s718_s1 + $0xc4] ss:$16 sps:$4 sm:$0xff]   ;;  %v528_v6 = vld [vmem:[%s718_s1 + $0xcc] ss:$16 sps:$4 sm:$0xff]  }
   0x3   :  { %249 = vmatpush1.bf16.msra.mxu0 %v524_v3  ;;  %300 = vmatpush1.bf16.msra.mxu1 %v525_v4  ;;  %v530_v7 = vld [vmem:[%s718_s1 + $0xc0] ss:$16 sps:$4 sm:$0xff]   ;;  %v531_v8 = vld [vmem:[%s718_s1 + $0xc8] ss:$16 sps:$4 sm:$0xff]   ;;  %v532_v9 = vld [vmem:[%s718_s1 + $0xa4] ss:$16 sps:$4 sm:$0xff]  }
   0x4   :  { %250 = vmatprep.subr.bf16.mxu0 %v526_v5  ;;  %301 = vmatprep.subr.bf16.mxu1 %v528_v6  ;;  %v534_v10 = vld [vmem:[%s718_s1 + $0xac] ss:$16 sps:$4 sm:$0xff]   ;;  %v536_v11 = vld [vmem:[%s718_s1 + $0xa0] ss:$16 sps:$4 sm:$0xff]   ;;  %v537_v12 = vld [vmem:[%s718_s1 + $0xa8] ss:$16 sps:$4 sm:$0xff]  }
   0x5   :  { %v538_v13 = vld [vmem:[%s718_s1 + $0x84] ss:$16 sps:$4 sm:$0xff]   ;;  %v540_v14 = vld [vmem:[%s718_s1 + $0x8c] ss:$16 sps:$4 sm:$0xff]   ;;  %v542_v15 = vld [vmem:[%s718_s1 + $0x80] ss:$16 sps:$4 sm:$0xff]  }
   0x6   :  { %v543_v16 = vld [vmem:[%s718_s1 + $0x88] ss:$16 sps:$4 sm:$0xff]   ;;  %v544_v17 = vld [vmem:[%s718_s1 + $0x64] ss:$16 sps:$4 sm:$0xff]   ;;  %v546_v18 = vld [vmem:[%s718_s1 + $0x6c] ss:$16 sps:$4 sm:$0xff]  }
   0x7   :  { %251 = vmatpush1.bf16.msra.mxu0 %v530_v7  ;;  %302 = vmatpush1.bf16.msra.mxu1 %v531_v8  ;;  %v548_v19 = vld [vmem:[%s718_s1 + $0x60] ss:$16 sps:$4 sm:$0xff]   ;;  %v549_v20 = vld [vmem:[%s718_s1 + $0x68] ss:$16 sps:$4 sm:$0xff]   ;;  %v550_v21 = vld [vmem:[%s718_s1 + $0x44] ss:$16 sps:$4 sm:$0xff]  }
   0x8   :  { %252 = vmatprep.subr.bf16.mxu0 %v532_v9  ;;  %303 = vmatprep.subr.bf16.mxu1 %v534_v10  ;;  %v552_v22 = vld [vmem:[%s718_s1 + $0x4c] ss:$16 sps:$4 sm:$0xff]   ;;  %v554_v23 = vld [vmem:[%s718_s1 + $0x40] ss:$16 sps:$4 sm:$0xff]   ;;  %v555_v24 = vld [vmem:[%s718_s1 + $0x48] ss:$16 sps:$4 sm:$0xff]  }
   0x9   :  { %v556_v25 = vld [vmem:[%s718_s1 + $0x24] ss:$16 sps:$4 sm:$0xff]   ;;  %v558_v26 = vld [vmem:[%s718_s1 + $0x2c] ss:$16 sps:$4 sm:$0xff]   ;;  %v560_v27 = vld [vmem:[%s718_s1 + $0x20] ss:$16 sps:$4 sm:$0xff]  }
   0xa   :  { %v561_v28 = vld [vmem:[%s718_s1 + $0x28] ss:$16 sps:$4 sm:$0xff]   ;;  %v562_v29 = vld [vmem:[%s718_s1 + $0x4] ss:$16 sps:$4 sm:$0xff]   ;;  %v564_v30 = vld [vmem:[%s718_s1 + $0xc] ss:$16 sps:$4 sm:$0xff]  }
   0xb   :  { %253 = vmatpush1.bf16.msra.mxu0 %v536_v11  ;;  %304 = vmatpush1.bf16.msra.mxu1 %v537_v12  ;;  %v566_v31 = vld [vmem:[%s718_s1] ss:$16 sps:$4 sm:$0xff]   ;;  %v567_v32 = vld [vmem:[%s718_s1 + $0x8] ss:$16 sps:$4 sm:$0xff]   ;;  %v392_v36 = vshrl.u32 %v391_v35, 7 }
   0xc   :  { %254 = vmatprep.subr.bf16.mxu0 %v538_v13  ;;  %305 = vmatprep.subr.bf16.mxu1 %v540_v14  ;;  %v568_v33 = vld [vmem:[%s719_s0] sm:$0xff]   ;;  %v569_v34 = vld [vmem:[%s719_s0 + $0x8] ss:$0 sps:$4 sm:$0xff]  }
   0xd   :  { %v393_v37 = vsub.s32 0, %v392_v36  ;;  %v401_v38 = vsub.s32 2, %v392_v36  ;;  %v397_v39 = vsub.s32 1, %v392_v36  ;;  %v405_v40 = vsub.s32 3, %v392_v36  ;;  %v389_v41 = vld [vmem:[%s720_s2] sm:$0xf] }
   0xf   :  { %255 = vmatpush1.bf16.msra.mxu0 %v542_v15  ;;  %306 = vmatpush1.bf16.msra.mxu1 %v543_v16  ;;  %v394_v42 = vrot.slane %v389_v41, %v393_v37  ;;  %v402_v43 = vrot.slane %v389_v41, %v401_v38  ;;  %v398_v44 = vrot.slane %v389_v41, %v397_v39 }
  0x10   :  { %256 = vmatprep.subr.bf16.mxu0 %v544_v17  ;;  %307 = vmatprep.subr.bf16.mxu1 %v546_v18  ;;  %v406_v45 = vrot.slane %v389_v41, %v405_v40 }
  0x13   :  { %257 = vmatpush1.bf16.msra.mxu0 %v548_v19  ;;  %308 = vmatpush1.bf16.msra.mxu1 %v549_v20 }
  0x14   :  { %258 = vmatprep.subr.bf16.mxu0 %v550_v21  ;;  %309 = vmatprep.subr.bf16.mxu1 %v552_v22 }
  0x17   :  { %259 = vmatpush1.bf16.msra.mxu0 %v554_v23  ;;  %310 = vmatpush1.bf16.msra.mxu1 %v555_v24 }
  0x18   :  { %260 = vmatprep.subr.bf16.mxu0 %v556_v25  ;;  %311 = vmatprep.subr.bf16.mxu1 %v558_v26 }
  0x1b   :  { %261 = vmatpush1.bf16.msra.mxu0 %v560_v27  ;;  %312 = vmatpush1.bf16.msra.mxu1 %v561_v28 }
  0x1c   :  { %262 = vmatprep.subr.bf16.mxu0 %v562_v29  ;;  %313 = vmatprep.subr.bf16.mxu1 %v564_v30 }
  0x1f   :  { %263 = vmatpush1.bf16.msra.mxu0 %v566_v31  ;;  %314 = vmatpush1.bf16.msra.mxu1 %v567_v32 }
  0x22   :  { %281 = vmatmul.mubr.bf16.vlgmr.msra.gmra.mxu0 %v568_v33  ;;  %332 = vmatmul.mubr.bf16.vlgmr.msra.gmra.mxu1 %v568_v33 }
  0x23   :  { %290 = vmatprep.mubr.bf16.mxu0 %v570_v1  ;;  %341 = vmatprep.mubr.bf16.mxu1 %v570_v1 }
  0x2a   :  { %291 = vmatmul.mubr.bf16.gmra.mxu0 %v569_v34  ;;  %342 = vmatmul.mubr.bf16.gmra.mxu1 %v569_v34 }
  0xe2   :  { %v282_v46 = vpop.f32.mrf.mxu0  ;;  %v333_v47 = vpop.f32.mrf.mxu1 }
  0xe3   :  { %v411_v50 = vadd.f32 %v394_v42, %v282_v46  ;;  %v413_v51 = vadd.f32 %v402_v43, %v333_v47 }
  0xe4   :  { %v284_v48 = vpop.f32.mrf.mxu0  ;;  %v335_v49 = vpop.f32.mrf.mxu1 }
  0xe5   :  { %v412_v52 = vadd.f32 %v398_v44, %v284_v48  ;;  %v414_v53 = vadd.f32 %v406_v45, %v335_v49 }
  0xe6   :  { %v286_v54 = vpop.f32.mrf.mxu0  ;;  %v337_v55 = vpop.f32.mrf.mxu1 }
  0xe7   :  { %v513_v56 = vpack.c.bf16 %v412_v52, %v411_v50  ;;  %v514_v57 = vpack.c.bf16 %v414_v53, %v413_v51  ;;  %v415_v60 = vadd.f32 %v394_v42, %v286_v54  ;;  %v417_v61 = vadd.f32 %v402_v43, %v337_v55 }
  0xe8   :  { %v288_v58 = vpop.f32.mrf.mxu0  ;;  %v339_v59 = vpop.f32.mrf.mxu1 }
  0xe9   :  { %463 = vst [vmem:[%s721_s3] sm:$0xff] %v513_v56  ;;  %464 = vst [vmem:[%s721_s3 + $0x8] sm:$0xff] %v514_v57  ;;  %v416_v62 = vadd.f32 %v398_v44, %v288_v58  ;;  %v418_v63 = vadd.f32 %v406_v45, %v339_v59 }
  0xea   :  { %v292_v0 = vpop.f32.mrf.mxu0  ;;  %v343_v1 = vpop.f32.mrf.mxu1 }
  0xeb   :  { %v515_v2 = vpack.c.bf16 %v416_v62, %v415_v60  ;;  %v516_v3 = vpack.c.bf16 %v418_v63, %v417_v61  ;;  %v419_v6 = vadd.f32 %v394_v42, %v292_v0  ;;  %v421_v7 = vadd.f32 %v402_v43, %v343_v1 }
  0xec   :  { %v294_v4 = vpop.f32.mrf.mxu0  ;;  %v345_v5 = vpop.f32.mrf.mxu1 }
  0xed   :  { %465 = vst [vmem:[%s721_s3 + $0x10] sm:$0xff] %v515_v2  ;;  %466 = vst [vmem:[%s721_s3 + $0x18] sm:$0xff] %v516_v3  ;;  %v420_v8 = vadd.f32 %v398_v44, %v294_v4  ;;  %v422_v9 = vadd.f32 %v406_v45, %v345_v5 }
  0xee   :  { %v296_v10 = vpop.f32.mrf.mxu0  ;;  %v347_v11 = vpop.f32.mrf.mxu1 }
  0xef   :  { %v517_v12 = vpack.c.bf16 %v420_v8, %v419_v6  ;;  %v518_v13 = vpack.c.bf16 %v422_v9, %v421_v7 }
  0xf0   :  { %v297_v14 = vpop.f32.mrf.mxu0  ;;  %v348_v15 = vpop.f32.mrf.mxu1 }
  0xf1   :  { %467 = vst [vmem:[%s721_s3 + $0x20] sm:$0xff] %v517_v12  ;;  %468 = vst [vmem:[%s721_s3 + $0x28] sm:$0xff] %v518_v13 }

// kernel: lstm_asr_forward.13
= control target key start
LH: loop header
LB: loop body
LE: loop exit
PB: predicated region body
PF: predicated region fallthrough
CT: control target
= control target key end

     0   :  { %v193_v0 = vmov 0.0   ;;  %vm194_vm0 = vmmov 0   ;;  %s248_s1 = inlined_call_operand.vmem [shape: bf16[128,128], index: 1, kind: input, shape index: {}]   ;;  %s249_s0 = inlined_call_operand.vmem [shape: bf16[8,128], index: 0, kind: input, shape index: {}]   ;;  %s250_s2 = inlined_call_operand.vmem [shape: f32[1,128], index: 2, kind: input, shape index: {}]   ;;  %s251_s3 = inlined_call_operand.vmem [shape: f32[8,128], index: 3, kind: output, shape index: {}]  }
   0x1   :  { %163 = vmatprep.subr.bf16.mxu0 %v193_v0  ;;  %v185_v1 = vld [vmem:[%s248_s1 + $0x38] sm:$0xff]   ;;  %179 = vmatprep.mubr.msk.bf16.mxu0 %vm194_vm0, %v193_v0  ;;  %v186_v2 = vld [vmem:[%s248_s1 + $0x30] sm:$0xff]   ;;  %v187_v3 = vld [vmem:[%s248_s1 + $0x28] sm:$0xff]  }
   0x2   :  { %164 = vmatpush3.bf16.msra.mxu0 %v185_v1  ;;  %v188_v4 = vld [vmem:[%s248_s1 + $0x20] sm:$0xff]   ;;  %v189_v5 = vld [vmem:[%s248_s1 + $0x18] sm:$0xff]   ;;  %v190_v6 = vld [vmem:[%s248_s1 + $0x10] sm:$0xff]  }
   0x3   :  { %165 = vmatprep.subr.bf16.mxu0 %v193_v0  ;;  %v191_v7 = vld [vmem:[%s248_s1 + $0x8] sm:$0xff]   ;;  %v192_v8 = vld [vmem:[%s248_s1] sm:$0xff]  }
   0x4   :  { %v21_v9 = vld [vmem:[%s249_s0] sm:$0xf] }
   0x5   :  { %v153_v10 = vld [vmem:[%s250_s2] ss:$0 sm:$0xff] }
   0x6   :  { %166 = vmatpush3.bf16.msra.mxu0 %v186_v2 }
   0x7   :  { %167 = vmatprep.subr.bf16.mxu0 %v193_v0 }
   0xa   :  { %168 = vmatpush3.bf16.msra.mxu0 %v187_v3 }
   0xb   :  { %169 = vmatprep.subr.bf16.mxu0 %v193_v0 }
   0xe   :  { %170 = vmatpush3.bf16.msra.mxu0 %v188_v4 }
   0xf   :  { %171 = vmatprep.subr.bf16.mxu0 %v193_v0 }
  0x12   :  { %172 = vmatpush3.bf16.msra.mxu0 %v189_v5 }
  0x13   :  { %173 = vmatprep.subr.bf16.mxu0 %v193_v0 }
  0x16   :  { %174 = vmatpush3.bf16.msra.mxu0 %v190_v6 }
  0x17   :  { %175 = vmatprep.subr.bf16.mxu0 %v193_v0 }
  0x1a   :  { %176 = vmatpush3.bf16.msra.mxu0 %v191_v7 }
  0x1b   :  { %177 = vmatprep.subr.bf16.mxu0 %v193_v0 }
  0x1e   :  { %178 = vmatpush3.bf16.msra.mxu0 %v192_v8 }
  0x21   :  { %180 = vmatmul.mubr.bf16.vlgmr.msra.gmra.mxu0 %v21_v9 }
  0xe1   :  { %v120_v11 = vpop.f32.mrf.mxu0 }
  0xe2   :  { %v139_v12 = vadd.f32 %v153_v10, %v120_v11 }
  0xe3   :  { %v181_v13 = vpop.f32.mrf.mxu0 }
  0xe4   :  { %140 = vst [vmem:[%s251_s3] sm:$0xff] %v139_v12 }
  0xe5   :  { %v123_v14 = vpop.f32.mrf.mxu0 }
  0xe7   :  { %v182_v15 = vpop.f32.mrf.mxu0 }

// kernel: lstm_asr_forward.10
= control target key start
LH: loop header
LB: loop body
LE: loop exit
PB: predicated region body
PF: predicated region fallthrough
CT: control target
= control target key end

     0   :  { %v726_v0 = vmov 0.0   ;;  %s749_s12 = smov 0   ;;  %s901_s0 = inlined_call_operand.vmem [shape: bf16[3,8,512], index: 0, kind: input, shape index: {}]   ;;  %s902_s1 = inlined_call_operand.vmem [shape: bf16[128,512], index: 1, kind: input, shape index: {}]   ;;  %s903_s2 = inlined_call_operand.vmem [shape: s32[8,1], index: 2, kind: input, shape index: {}]   ;;  %s904_s3 = inlined_call_operand.vmem [shape: bf16[3,8,128], index: 3, kind: output, shape index: {}]  }
   0x1   :  { %19 = vst [vmem:[#allocation2] sm:$0xff] %v726_v0  ;;  %20 = vst [vmem:[#allocation3] sm:$0xff] %v726_v0 }
   0x2 LB: > { %v727_v1 = vmov 0.0   ;;  %v670_v2 = vld [vmem:[%s902_s1 + $0xe4] ss:$16 sps:$4 sm:$0xff]   ;;  %v671_v3 = vld [vmem:[%s902_s1 + $0xe0] ss:$16 sps:$4 sm:$0xff]   ;;  %vm728_vm0 = vmmov 0   ;;  %s724_s12 = sphi %s749_s12, %s26_s12  }
   0x3   : > { %579 = vmatprep.subr.bf16.mxu0 %v727_v1  ;;  %599 = vmatprep.subr.bf16.mxu1 %v727_v1  ;;  %v672_v4 = vld [vmem:[%s902_s1 + $0xc4] ss:$16 sps:$4 sm:$0xff]   ;;  %v673_v5 = vld [vmem:[%s902_s1 + $0xc0] ss:$16 sps:$4 sm:$0xff]   ;;  %v686_v20 = vld [vmem:[%s902_s1 + $0xe8] ss:$16 sps:$4 sm:$0xff]  }
   0x4   : > { %595 = vmatprep.mubr.msk.bf16.mxu0 %vm728_vm0, %v727_v1  ;;  %615 = vmatprep.mubr.msk.bf16.mxu1 %vm728_vm0, %v727_v1  ;;  %v674_v6 = vld [vmem:[%s902_s1 + $0xa4] ss:$16 sps:$4 sm:$0xff]   ;;  %v675_v7 = vld [vmem:[%s902_s1 + $0xa0] ss:$16 sps:$4 sm:$0xff]   ;;  %v687_v21 = vld [vmem:[%s902_s1 + $0xec] ss:$16 sps:$4 sm:$0xff]  }
   0x5   : > { %580 = vmatpush3.bf16.msra.mxu0 %v670_v2  ;;  %600 = vmatpush3.bf16.msra.mxu1 %v671_v3  ;;  %v676_v8 = vld [vmem:[%s902_s1 + $0x84] ss:$16 sps:$4 sm:$0xff]   ;;  %v677_v9 = vld [vmem:[%s902_s1 + $0x80] ss:$16 sps:$4 sm:$0xff]   ;;  %v688_v22 = vld [vmem:[%s902_s1 + $0xc8] ss:$16 sps:$4 sm:$0xff]  }
   0x6   : > { %581 = vmatprep.subr.bf16.mxu0 %v727_v1  ;;  %601 = vmatprep.subr.bf16.mxu1 %v727_v1  ;;  %v678_v10 = vld [vmem:[%s902_s1 + $0x64] ss:$16 sps:$4 sm:$0xff]   ;;  %v679_v11 = vld [vmem:[%s902_s1 + $0x60] ss:$16 sps:$4 sm:$0xff]   ;;  %v689_v23 = vld [vmem:[%s902_s1 + $0xcc] ss:$16 sps:$4 sm:$0xff]  }
   0x7   : > { %v680_v12 = vld [vmem:[%s902_s1 + $0x44] ss:$16 sps:$4 sm:$0xff]   ;;  %v681_v13 = vld [vmem:[%s902_s1 + $0x40] ss:$16 sps:$4 sm:$0xff]   ;;  %v690_v24 = vld [vmem:[%s902_s1 + $0xa8] ss:$16 sps:$4 sm:$0xff]  }
   0x8   : > { %v682_v14 = vld [vmem:[%s902_s1 + $0x24] ss:$16 sps:$4 sm:$0xff]   ;;  %v683_v15 = vld [vmem:[%s902_s1 + $0x20] ss:$16 sps:$4 sm:$0xff]   ;;  %v691_v25 = vld [vmem:[%s902_s1 + $0xac] ss:$16 sps:$4 sm:$0xff]  }
   0x9   : > { %582 = vmatpush3.bf16.msra.mxu0 %v672_v4  ;;  %602 = vmatpush3.bf16.msra.mxu1 %v673_v5  ;;  %v684_v16 = vld [vmem:[%s902_s1 + $0x4] ss:$16 sps:$4 sm:$0xff]   ;;  %v685_v18 = vld [vmem:[%s902_s1] ss:$16 sps:$4 sm:$0xff]   ;;  %v692_v26 = vld [vmem:[%s902_s1 + $0x88] ss:$16 sps:$4 sm:$0xff]  }
   0xa   : > { %583 = vmatprep.subr.bf16.mxu0 %v727_v1  ;;  %603 = vmatprep.subr.bf16.mxu1 %v727_v1  ;;  %v27_v17 = vld [vmem:[#allocation2] sm:$0xff]  ;;  %v693_v27 = vld [vmem:[%s902_s1 + $0x8c] ss:$16 sps:$4 sm:$0xff]   ;;  %v694_v28 = vld [vmem:[%s902_s1 + $0x68] ss:$16 sps:$4 sm:$0xff]   ;;  %s542_s22 = sshll.u32 %s724_s12, 4 }
   0xb   : > { %v28_v19 = vpack.c.bf16 %v27_v17, %v27_v17  ;;  %v695_v29 = vld [vmem:[%s902_s1 + $0x6c] ss:$16 sps:$4 sm:$0xff]   ;;  %v696_v30 = vld [vmem:[%s902_s1 + $0x48] ss:$16 sps:$4 sm:$0xff]   ;;  %s31_s25 = scalar_lea.vmem %s901_s0, %s542_s22  ;;  %s541_s26 = sshll.u32 %s724_s12, 2 }
   0xc   : > { %v697_v31 = vld [vmem:[%s902_s1 + $0x4c] ss:$16 sps:$4 sm:$0xff]   ;;  %v698_v32 = vld [vmem:[%s902_s1 + $0x28] ss:$16 sps:$4 sm:$0xff]   ;;  %s489_s29 = scalar_lea.vmem %s904_s3, %s541_s26  ;;  %s26_s12 = sadd.s32 1, %s724_s12  }
   0xd   : > { %584 = vmatpush3.bf16.msra.mxu0 %v674_v6  ;;  %604 = vmatpush3.bf16.msra.mxu1 %v675_v7  ;;  %v699_v33 = vld [vmem:[%s902_s1 + $0x2c] ss:$16 sps:$4 sm:$0xff]   ;;  %v700_v34 = vld [vmem:[%s902_s1 + $0x8] ss:$16 sps:$4 sm:$0xff]   ;;  %p23_p0 = scmp.ge.s32.totalorder %s26_s12, 3  }
   0xe   : > { %585 = vmatprep.subr.bf16.mxu0 %v727_v1  ;;  %605 = vmatprep.subr.bf16.mxu1 %v727_v1  ;;  %v701_v35 = vld [vmem:[%s902_s1 + $0xc] ss:$16 sps:$4 sm:$0xff]   ;;  %v32_v36 = vld [vmem:[%s31_s25 + $0x4] sm:$0xff]  }
   0xf   : > { %v147_v37 = vld [vmem:[%s31_s25] ss:$12 sps:$4 sm:$0xff]   ;;  %v33_v39 = vunpack.c.l.bf16 %v32_v36  ;;  %v261_v55 = vunpack.c.h.bf16 %v32_v36 }
  0x10   : > { %v148_v41 = vunpack.c.l.bf16 %v147_v37  ;;  %v371_v57 = vunpack.c.h.bf16 %v147_v37  ;;  %v145_v6 = vld [vmem:[#allocation3] sm:$0xff] }
  0x11   : > { %586 = vmatpush3.bf16.msra.mxu0 %v676_v8  ;;  %606 = vmatpush3.bf16.msra.mxu1 %v677_v9 }
  0x12   : > { %587 = vmatprep.subr.bf16.mxu0 %v727_v1  ;;  %607 = vmatprep.subr.bf16.mxu1 %v727_v1 }
  0x15   : > { %588 = vmatpush3.bf16.msra.mxu0 %v678_v10  ;;  %608 = vmatpush3.bf16.msra.mxu1 %v679_v11 }
  0x16   : > { %589 = vmatprep.subr.bf16.mxu0 %v727_v1  ;;  %609 = vmatprep.subr.bf16.mxu1 %v727_v1 }
  0x19   : > { %590 = vmatpush3.bf16.msra.mxu0 %v680_v12  ;;  %610 = vmatpush3.bf16.msra.mxu1 %v681_v13 }
  0x1a   : > { %591 = vmatprep.subr.bf16.mxu0 %v727_v1  ;;  %611 = vmatprep.subr.bf16.mxu1 %v727_v1 }
  0x1d   : > { %592 = vmatpush3.bf16.msra.mxu0 %v682_v14  ;;  %612 = vmatpush3.bf16.msra.mxu1 %v683_v15 }
  0x1e   : > { %593 = vmatprep.subr.bf16.mxu0 %v727_v1  ;;  %613 = vmatprep.subr.bf16.mxu1 %v727_v1 }
  0x21   : > { %594 = vmatpush3.bf16.msra.mxu0 %v684_v16  ;;  %614 = vmatpush3.bf16.msra.mxu1 %v685_v18 }
  0x22   : > { %619 = vmatprep.subr.bf16.mxu0 %v727_v1  ;;  %639 = vmatprep.subr.bf16.mxu1 %v727_v1 }
  0x24   : > { %596 = vmatmul.mubr.bf16.vlgmr.msra.gmra.mxu0 %v28_v19  ;;  %616 = vmatmul.mubr.bf16.vlgmr.msra.gmra.mxu1 %v28_v19 }
  0x25   : > { %620 = vmatpush3.bf16.msra.mxu0 %v686_v20  ;;  %640 = vmatpush3.bf16.msra.mxu1 %v687_v21 }
  0x26   : > { %621 = vmatprep.subr.bf16.mxu0 %v727_v1  ;;  %641 = vmatprep.subr.bf16.mxu1 %v727_v1 }
  0x27   : > { %635 = vmatprep.mubr.msk.bf16.mxu0 %vm728_vm0, %v727_v1  ;;  %655 = vmatprep.mubr.msk.bf16.mxu1 %vm728_vm0, %v727_v1 }
  0x29   : > { %622 = vmatpush3.bf16.msra.mxu0 %v688_v22  ;;  %642 = vmatpush3.bf16.msra.mxu1 %v689_v23 }
  0x2a   : > { %623 = vmatprep.subr.bf16.mxu0 %v727_v1  ;;  %643 = vmatprep.subr.bf16.mxu1 %v727_v1 }
  0x2d   : > { %624 = vmatpush3.bf16.msra.mxu0 %v690_v24  ;;  %644 = vmatpush3.bf16.msra.mxu1 %v691_v25 }
  0x2e   : > { %625 = vmatprep.subr.bf16.mxu0 %v727_v1  ;;  %645 = vmatprep.subr.bf16.mxu1 %v727_v1 }
  0x31   : > { %626 = vmatpush3.bf16.msra.mxu0 %v692_v26  ;;  %646 = vmatpush3.bf16.msra.mxu1 %v693_v27 }
  0x32   : > { %627 = vmatprep.subr.bf16.mxu0 %v727_v1  ;;  %647 = vmatprep.subr.bf16.mxu1 %v727_v1 }
  0x35   : > { %628 = vmatpush3.bf16.msra.mxu0 %v694_v28  ;;  %648 = vmatpush3.bf16.msra.mxu1 %v695_v29 }
  0x36   : > { %629 = vmatprep.subr.bf16.mxu0 %v727_v1  ;;  %649 = vmatprep.subr.bf16.mxu1 %v727_v1 }
  0x39   : > { %630 = vmatpush3.bf16.msra.mxu0 %v696_v30  ;;  %650 = vmatpush3.bf16.msra.mxu1 %v697_v31 }
  0x3a   : > { %631 = vmatprep.subr.bf16.mxu0 %v727_v1  ;;  %651 = vmatprep.subr.bf16.mxu1 %v727_v1 }
  0x3d   : > { %632 = vmatpush3.bf16.msra.mxu0 %v698_v32  ;;  %652 = vmatpush3.bf16.msra.mxu1 %v699_v33 }
  0x3e   : > { %633 = vmatprep.subr.bf16.mxu0 %v727_v1  ;;  %653 = vmatprep.subr.bf16.mxu1 %v727_v1 }
  0x41   : > { %634 = vmatpush3.bf16.msra.mxu0 %v700_v34  ;;  %654 = vmatpush3.bf16.msra.mxu1 %v701_v35 }
  0x44   : > { %636 = vmatmul.mubr.bf16.vlgmr.msra.gmra.mxu0 %v28_v19  ;;  %656 = vmatmul.mubr.bf16.vlgmr.msra.gmra.mxu1 %v28_v19 }
  0xe4   : > { %v132_v38 = vpop.f32.mrf.mxu0  ;;  %v247_v40 = vpop.f32.mrf.mxu1 }
  0xe5   : > { %v138_v45 = vadd.f32 %v132_v38, %v33_v39  ;;  %v253_v47 = vadd.f32 %v247_v40, %v148_v41 }
  0xe6   : > { %v597_v42 = vpop.f32.mrf.mxu0  ;;  %v617_v43 = vpop.f32.mrf.mxu1 }
  0xe7   : > { %v514_v50 = vmul.f32 -1.442695, %v138_v45  ;;  %v523_v51 = vmul.f32 -1.442695, %v253_v47 }
  0xe8   : > { %v135_v44 = vpop.f32.mrf.mxu0  ;;  %v250_v46 = vpop.f32.mrf.mxu1 }
  0xe9   : > { %702 = vpow2.f32 %v514_v50 }
  0xea   : > { %v598_v48 = vpop.f32.mrf.mxu0  ;;  %v618_v49 = vpop.f32.mrf.mxu1  ;;  %704 = vpow2.f32 %v523_v51 }
  0xf6   : > { %v703_v52 = vpop.eup %702 }
  0xf7   : > { %v705_v53 = vpop.eup %704  ;;  %v142_v54 = vadd.f32 1.0, %v703_v52 }
  0xf8   : > { %v257_v56 = vadd.f32 1.0, %v705_v53 }
  0xf9   : > { %706 = vrcp.f32 %v142_v54 }
  0xfa   : > { %708 = vrcp.f32 %v257_v56 }
 0x104   : > { %v360_v58 = vpop.f32.mrf.mxu0  ;;  %v470_v60 = vpop.f32.mrf.mxu1 }
 0x105   : > { %v366_v59 = vadd.f32 %v360_v58, %v261_v55  ;;  %v476_v61 = vadd.f32 %v470_v60, %v371_v57 }
 0x106   : > { %v637_v62 = vpop.f32.mrf.mxu0  ;;  %v657_v63 = vpop.f32.mrf.mxu1 }
 0x107   : > { %710 = vtanh.f32 %v366_v59  ;;  %v540_v0 = vmul.f32 -1.442695, %v476_v61  ;;  %v707_v5 = vpop.eup %706 }
 0x108   : > { %v363_v1 = vpop.f32.mrf.mxu0  ;;  %v473_v2 = vpop.f32.mrf.mxu1  ;;  %v146_v9 = vmul.f32 %v707_v5, %v145_v6 }
 0x109   : > { %712 = vpow2.f32 %v540_v0  ;;  %v709_v7 = vpop.eup %708 }
 0x10a   : > { %v638_v3 = vpop.f32.mrf.mxu0  ;;  %v658_v4 = vpop.f32.mrf.mxu1 }
 0x114   : > { %v711_v8 = vpop.eup %710 }
 0x115   : > { %v368_v10 = vmul.f32 %v711_v8, %v709_v7 }
 0x116   : > { %v713_v11 = vpop.eup %712 }
 0x117   : > { %v369_v12 = vadd.f32 %v368_v10, %v146_v9  ;;  %v480_v13 = vadd.f32 1.0, %v713_v11 }
 0x119   : > { %714 = vtanh.f32 %v369_v12  ;;  %485 = vst [vmem:[#allocation3] sm:$0xff] %v369_v12 }
 0x11a   : > { %716 = vrcp.f32 %v480_v13 }
 0x126   : > { %v715_v14 = vpop.eup %714 }
 0x127   : > { %v717_v15 = vpop.eup %716 }
 0x128   : > { %v484_v16 = vmul.f32 %v717_v15, %v715_v14  ;;  %25 = sbr.rel (!%p23_p0) target bundleno = 2 (0x2), region = 45 }
 0x12a   : > { %486 = vst [vmem:[#allocation2] sm:$0xff] %v484_v16  ;;  %v487_v17 = vpack.c.bf16 %v484_v16, %v484_v16 }
 0x12c   : > { %490 = vst [vmem:[%s489_s29] sm:$0xf] %v487_v17 }

// kernel: lstm_asr_forward.12
= control target key start
LH: loop header
LB: loop body
LE: loop exit
PB: predicated region body
PF: predicated region fallthrough
CT: control target
= control target key end

     0   :  { %v738_v0 = vmov 0.0   ;;  %s762_s12 = smov 0   ;;  %s918_s0 = inlined_call_operand.vmem [shape: bf16[3,8,512], index: 0, kind: input, shape index: {}]   ;;  %s919_s1 = inlined_call_operand.vmem [shape: bf16[128,512], index: 1, kind: input, shape index: {}]   ;;  %s920_s2 = inlined_call_operand.vmem [shape: s32[8,1], index: 2, kind: input, shape index: {}]   ;;  %s921_s3 = inlined_call_operand.vmem [shape: f32[3,8,128], index: 3, kind: output, shape index: {}]  }
   0x1   :  { %19 = vst [vmem:[#allocation2] sm:$0xff] %v738_v0  ;;  %20 = vst [vmem:[#allocation3] sm:$0xff] %v738_v0 }
   0x2 LB: > { %v739_v1 = vmov 0.0   ;;  %v682_v2 = vld [vmem:[%s919_s1 + $0xe4] ss:$16 sps:$4 sm:$0xff]   ;;  %v683_v3 = vld [vmem:[%s919_s1 + $0xe0] ss:$16 sps:$4 sm:$0xff]   ;;  %vm740_vm0 = vmmov 0   ;;  %v490_v21 = vstv %s736_s12  ;;  %s736_s12 = sphi %s762_s12, %s26_s12  }
   0x3   : > { %589 = vmatprep.subr.bf16.mxu0 %v739_v1  ;;  %609 = vmatprep.subr.bf16.mxu1 %v739_v1  ;;  %v684_v4 = vld [vmem:[%s919_s1 + $0xc4] ss:$16 sps:$4 sm:$0xff]   ;;  %v685_v5 = vld [vmem:[%s919_s1 + $0xc0] ss:$16 sps:$4 sm:$0xff]   ;;  %v741_v12 = vmov 0   ;;  %s552_s27 = sshll.u32 %s736_s12, 4 }
   0x4   : > { %605 = vmatprep.mubr.msk.bf16.mxu0 %vm740_vm0, %v739_v1  ;;  %625 = vmatprep.mubr.msk.bf16.mxu1 %vm740_vm0, %v739_v1  ;;  %v686_v6 = vld [vmem:[%s919_s1 + $0xa4] ss:$16 sps:$4 sm:$0xff]   ;;  %v687_v7 = vld [vmem:[%s919_s1 + $0xa0] ss:$16 sps:$4 sm:$0xff]   ;;  %v698_v22 = vld [vmem:[%s919_s1 + $0xe8] ss:$16 sps:$4 sm:$0xff]   ;;  %s31_s30 = scalar_lea.vmem %s918_s0, %s552_s27 }
   0x5   : > { %590 = vmatpush3.bf16.msra.mxu0 %v682_v2  ;;  %610 = vmatpush3.bf16.msra.mxu1 %v683_v3  ;;  %v688_v8 = vld [vmem:[%s919_s1 + $0x84] ss:$16 sps:$4 sm:$0xff]   ;;  %v689_v9 = vld [vmem:[%s919_s1 + $0x80] ss:$16 sps:$4 sm:$0xff]   ;;  %v699_v23 = vld [vmem:[%s919_s1 + $0xec] ss:$16 sps:$4 sm:$0xff]  }
   0x6   : > { %591 = vmatprep.subr.bf16.mxu0 %v739_v1  ;;  %611 = vmatprep.subr.bf16.mxu1 %v739_v1  ;;  %v690_v10 = vld [vmem:[%s919_s1 + $0x64] ss:$16 sps:$4 sm:$0xff]   ;;  %v691_v11 = vld [vmem:[%s919_s1 + $0x60] ss:$16 sps:$4 sm:$0xff]   ;;  %v700_v25 = vld [vmem:[%s919_s1 + $0xc8] ss:$16 sps:$4 sm:$0xff]  }
   0x7   : > { %681 = vset.pattern.permute.xlu0 %v741_v12  ;;  %v692_v13 = vld [vmem:[%s919_s1 + $0x44] ss:$16 sps:$4 sm:$0xff]   ;;  %v693_v14 = vld [vmem:[%s919_s1 + $0x40] ss:$16 sps:$4 sm:$0xff]   ;;  %v701_v27 = vld [vmem:[%s919_s1 + $0xcc] ss:$16 sps:$4 sm:$0xff]  }
   0x8   : > { %v694_v15 = vld [vmem:[%s919_s1 + $0x24] ss:$16 sps:$4 sm:$0xff]   ;;  %v695_v16 = vld [vmem:[%s919_s1 + $0x20] ss:$16 sps:$4 sm:$0xff]   ;;  %v702_v28 = vld [vmem:[%s919_s1 + $0xa8] ss:$16 sps:$4 sm:$0xff]  }
   0x9   : > { %592 = vmatpush3.bf16.msra.mxu0 %v684_v4  ;;  %612 = vmatpush3.bf16.msra.mxu1 %v685_v5  ;;  %v696_v17 = vld [vmem:[%s919_s1 + $0x4] ss:$16 sps:$4 sm:$0xff]   ;;  %v697_v19 = vld [vmem:[%s919_s1] ss:$16 sps:$4 sm:$0xff]   ;;  %v703_v29 = vld [vmem:[%s919_s1 + $0xac] ss:$16 sps:$4 sm:$0xff]  }
   0xa   : > { %593 = vmatprep.subr.bf16.mxu0 %v739_v1  ;;  %613 = vmatprep.subr.bf16.mxu1 %v739_v1  ;;  %v27_v18 = vld [vmem:[#allocation2] sm:$0xff]  ;;  %v704_v30 = vld [vmem:[%s919_s1 + $0x88] ss:$16 sps:$4 sm:$0xff]   ;;  %v705_v31 = vld [vmem:[%s919_s1 + $0x8c] ss:$16 sps:$4 sm:$0xff]   ;;  %s551_s4 = sshll.u32 %s736_s12, 3 }
   0xb   : > { %v28_v20 = vpack.c.bf16 %v27_v18, %v27_v18  ;;  %v489_v24 = vld [vmem:[%s920_s2] sm:$0xff]  ;;  %v706_v32 = vld [vmem:[%s919_s1 + $0x68] ss:$16 sps:$4 sm:$0xff]   ;;  %v707_v33 = vld [vmem:[%s919_s1 + $0x6c] ss:$16 sps:$4 sm:$0xff]   ;;  %s499_s7 = scalar_lea.vmem %s921_s3, %s551_s4  ;;  %s26_s12 = sadd.s32 1, %s736_s12  }
   0xc   : > { %vm491_vm1 = vcmp.gt.s32.totalorder %v489_v24, %v490_v21  ;;  %v708_v34 = vld [vmem:[%s919_s1 + $0x48] ss:$16 sps:$4 sm:$0xff]   ;;  %v709_v35 = vld [vmem:[%s919_s1 + $0x4c] ss:$16 sps:$4 sm:$0xff]   ;;  %p23_p0 = scmp.ge.s32.totalorder %s26_s12, 3  }
   0xd   : > { %594 = vmatpush3.bf16.msra.mxu0 %v686_v6  ;;  %614 = vmatpush3.bf16.msra.mxu1 %v687_v7  ;;  %v492_v26 = vsel %vm491_vm1, 1, %v741_v12  ;;  %v710_v36 = vld [vmem:[%s919_s1 + $0x28] ss:$16 sps:$4 sm:$0xff]   ;;  %v711_v37 = vld [vmem:[%s919_s1 + $0x2c] ss:$16 sps:$4 sm:$0xff]  }
   0xe   : > { %595 = vmatprep.subr.bf16.mxu0 %v739_v1  ;;  %615 = vmatprep.subr.bf16.mxu1 %v739_v1  ;;  %v712_v38 = vld [vmem:[%s919_s1 + $0x8] ss:$16 sps:$4 sm:$0xff]   ;;  %v713_v39 = vld [vmem:[%s919_s1 + $0xc] ss:$16 sps:$4 sm:$0xff]  }
   0xf   : > { %494 = vperm.xlu0 %681, %v492_v26   ;;  %v32_v40 = vld [vmem:[%s31_s30 + $0x4] sm:$0xff]   ;;  %v147_v41 = vld [vmem:[%s31_s30] ss:$12 sps:$4 sm:$0xff]  }
  0x10   : > { %v33_v43 = vunpack.c.l.bf16 %v32_v40  ;;  %v148_v45 = vunpack.c.l.bf16 %v147_v41  ;;  %v261_v59 = vunpack.c.h.bf16 %v32_v40  ;;  %v371_v61 = vunpack.c.h.bf16 %v147_v41 }
  0x11   : > { %596 = vmatpush3.bf16.msra.mxu0 %v688_v8  ;;  %616 = vmatpush3.bf16.msra.mxu1 %v689_v9 }
  0x12   : > { %597 = vmatprep.subr.bf16.mxu0 %v739_v1  ;;  %617 = vmatprep.subr.bf16.mxu1 %v739_v1 }
  0x15   : > { %598 = vmatpush3.bf16.msra.mxu0 %v690_v10  ;;  %618 = vmatpush3.bf16.msra.mxu1 %v691_v11  ;;  %v145_v10 = vld [vmem:[#allocation3] sm:$0xff] }
  0x16   : > { %599 = vmatprep.subr.bf16.mxu0 %v739_v1  ;;  %619 = vmatprep.subr.bf16.mxu1 %v739_v1 }
  0x19   : > { %600 = vmatpush3.bf16.msra.mxu0 %v692_v13  ;;  %620 = vmatpush3.bf16.msra.mxu1 %v693_v14 }
  0x1a   : > { %601 = vmatprep.subr.bf16.mxu0 %v739_v1  ;;  %621 = vmatprep.subr.bf16.mxu1 %v739_v1 }
  0x1d   : > { %602 = vmatpush3.bf16.msra.mxu0 %v694_v15  ;;  %622 = vmatpush3.bf16.msra.mxu1 %v695_v16 }
  0x1e   : > { %603 = vmatprep.subr.bf16.mxu0 %v739_v1  ;;  %623 = vmatprep.subr.bf16.mxu1 %v739_v1 }
  0x21   : > { %604 = vmatpush3.bf16.msra.mxu0 %v696_v17  ;;  %624 = vmatpush3.bf16.msra.mxu1 %v697_v19 }
  0x22   : > { %629 = vmatprep.subr.bf16.mxu0 %v739_v1  ;;  %649 = vmatprep.subr.bf16.mxu1 %v739_v1 }
  0x24   : > { %606 = vmatmul.mubr.bf16.vlgmr.msra.gmra.mxu0 %v28_v20  ;;  %626 = vmatmul.mubr.bf16.vlgmr.msra.gmra.mxu1 %v28_v20 }
  0x25   : > { %630 = vmatpush3.bf16.msra.mxu0 %v698_v22  ;;  %650 = vmatpush3.bf16.msra.mxu1 %v699_v23 }
  0x26   : > { %631 = vmatprep.subr.bf16.mxu0 %v739_v1  ;;  %651 = vmatprep.subr.bf16.mxu1 %v739_v1 }
  0x27   : > { %645 = vmatprep.mubr.msk.bf16.mxu0 %vm740_vm0, %v739_v1  ;;  %665 = vmatprep.mubr.msk.bf16.mxu1 %vm740_vm0, %v739_v1 }
  0x29   : > { %632 = vmatpush3.bf16.msra.mxu0 %v700_v25  ;;  %652 = vmatpush3.bf16.msra.mxu1 %v701_v27 }
  0x2a   : > { %633 = vmatprep.subr.bf16.mxu0 %v739_v1  ;;  %653 = vmatprep.subr.bf16.mxu1 %v739_v1 }
  0x2d   : > { %634 = vmatpush3.bf16.msra.mxu0 %v702_v28  ;;  %654 = vmatpush3.bf16.msra.mxu1 %v703_v29 }
  0x2e   : > { %635 = vmatprep.subr.bf16.mxu0 %v739_v1  ;;  %655 = vmatprep.subr.bf16.mxu1 %v739_v1 }
  0x31   : > { %636 = vmatpush3.bf16.msra.mxu0 %v704_v30  ;;  %656 = vmatpush3.bf16.msra.mxu1 %v705_v31 }
  0x32   : > { %637 = vmatprep.subr.bf16.mxu0 %v739_v1  ;;  %657 = vmatprep.subr.bf16.mxu1 %v739_v1 }
  0x35   : > { %638 = vmatpush3.bf16.msra.mxu0 %v706_v32  ;;  %658 = vmatpush3.bf16.msra.mxu1 %v707_v33 }
  0x36   : > { %639 = vmatprep.subr.bf16.mxu0 %v739_v1  ;;  %659 = vmatprep.subr.bf16.mxu1 %v739_v1 }
  0x39   : > { %640 = vmatpush3.bf16.msra.mxu0 %v708_v34  ;;  %660 = vmatpush3.bf16.msra.mxu1 %v709_v35 }
  0x3a   : > { %641 = vmatprep.subr.bf16.mxu0 %v739_v1  ;;  %661 = vmatprep.subr.bf16.mxu1 %v739_v1 }
  0x3d   : > { %642 = vmatpush3.bf16.msra.mxu0 %v710_v36  ;;  %662 = vmatpush3.bf16.msra.mxu1 %v711_v37 }
  0x3e   : > { %643 = vmatprep.subr.bf16.mxu0 %v739_v1  ;;  %663 = vmatprep.subr.bf16.mxu1 %v739_v1 }
  0x41   : > { %644 = vmatpush3.bf16.msra.mxu0 %v712_v38  ;;  %664 = vmatpush3.bf16.msra.mxu1 %v713_v39 }
  0x44   : > { %646 = vmatmul.mubr.bf16.vlgmr.msra.gmra.mxu0 %v28_v20  ;;  %666 = vmatmul.mubr.bf16.vlgmr.msra.gmra.mxu1 %v28_v20 }
  0x8a   : > { %v495_v18 = vpop.permute.xlu0 %494 }
  0x8b   : > { %vm496_vm2 = vcmp.eq.s32.totalorder %v495_v18, 1 }
  0xe4   : > { %v132_v42 = vpop.f32.mrf.mxu0  ;;  %v247_v44 = vpop.f32.mrf.mxu1 }
  0xe5   : > { %v138_v49 = vadd.f32 %v132_v42, %v33_v43  ;;  %v253_v51 = vadd.f32 %v247_v44, %v148_v45 }
  0xe6   : > { %v607_v46 = vpop.f32.mrf.mxu0  ;;  %v627_v47 = vpop.f32.mrf.mxu1 }
  0xe7   : > { %v524_v54 = vmul.f32 -1.442695, %v138_v49  ;;  %v533_v55 = vmul.f32 -1.442695, %v253_v51 }
  0xe8   : > { %v135_v48 = vpop.f32.mrf.mxu0  ;;  %v250_v50 = vpop.f32.mrf.mxu1 }
  0xe9   : > { %714 = vpow2.f32 %v524_v54 }
  0xea   : > { %v608_v52 = vpop.f32.mrf.mxu0  ;;  %v628_v53 = vpop.f32.mrf.mxu1  ;;  %716 = vpow2.f32 %v533_v55 }
  0xf6   : > { %v715_v56 = vpop.eup %714 }
  0xf7   : > { %v717_v57 = vpop.eup %716  ;;  %v142_v58 = vadd.f32 1.0, %v715_v56 }
  0xf8   : > { %v257_v60 = vadd.f32 1.0, %v717_v57 }
  0xf9   : > { %718 = vrcp.f32 %v142_v58 }
  0xfa   : > { %720 = vrcp.f32 %v257_v60 }
 0x104   : > { %v360_v62 = vpop.f32.mrf.mxu0  ;;  %v470_v0 = vpop.f32.mrf.mxu1 }
 0x105   : > { %v366_v63 = vadd.f32 %v360_v62, %v261_v59  ;;  %v476_v1 = vadd.f32 %v470_v0, %v371_v61 }
 0x106   : > { %v647_v2 = vpop.f32.mrf.mxu0  ;;  %v667_v3 = vpop.f32.mrf.mxu1 }
 0x107   : > { %722 = vtanh.f32 %v366_v63  ;;  %v550_v4 = vmul.f32 -1.442695, %v476_v1  ;;  %v719_v9 = vpop.eup %718 }
 0x108   : > { %v363_v5 = vpop.f32.mrf.mxu0  ;;  %v473_v6 = vpop.f32.mrf.mxu1  ;;  %v146_v13 = vmul.f32 %v719_v9, %v145_v10 }
 0x109   : > { %724 = vpow2.f32 %v550_v4  ;;  %v721_v11 = vpop.eup %720 }
 0x10a   : > { %v648_v7 = vpop.f32.mrf.mxu0  ;;  %v668_v8 = vpop.f32.mrf.mxu1 }
 0x114   : > { %v723_v12 = vpop.eup %722 }
 0x115   : > { %v368_v14 = vmul.f32 %v723_v12, %v721_v11 }
 0x116   : > { %v725_v15 = vpop.eup %724 }
 0x117   : > { %v369_v16 = vadd.f32 %v368_v14, %v146_v13  ;;  %v480_v17 = vadd.f32 1.0, %v725_v15 }
 0x119   : > { %485 = vst [vmem:[#allocation3] sm:$0xff] %v369_v16  ;;  %726 = vtanh.f32 %v369_v16 }
 0x11a   : > { %728 = vrcp.f32 %v480_v17 }
 0x126   : > { %v727_v19 = vpop.eup %726 }
 0x127   : > { %v729_v20 = vpop.eup %728  ;;  %25 = sbr.rel (!%p23_p0) target bundleno = 2 (0x2), region = 45 }
 0x128   : > { %v484_v21 = vmul.f32 %v729_v20, %v727_v19 }
 0x12a   : > { %486 = vst [vmem:[#allocation2] sm:$0xff] %v484_v21  ;;  %v497_v22 = vsel %vm496_vm2, %v484_v21, -1.0 }
 0x12b   : > { %500 = vst [vmem:[%s499_s7] sm:$0xff] %v497_v22 }

</bundles_post_ra>
